<compile_context>
chip_gen: v6e
topology: v6e:2x2x1
jax: 0.10.0
libtpu: 0.0.40
codegen_flags: <defaults>
</compile_context>

<pallas_src>
import functools

import jax
import jax.numpy as jnp
from jax.experimental import pallas as pl
from jax.experimental.pallas import tpu as pltpu


# ----------------------------------------------------------------------------
# Fused kernel: whole reverse-diffusion loop for one batch element.
#   grid = (B, T); state (xt ++ cond) held in VMEM scratch across T.
# ----------------------------------------------------------------------------
def _lfd_fused_kernel(coef_ref, xt0_ref, cond_ref, mask_ref, w1_ref, w2_ref,
                      b1t_ref, b2_ref, z_ref, out_ref,
                      xcat_sc, p1_sc, p2_sc,
                      *, H, W, gen_ch, cond_ch, hidden, num_steps):
    t = pl.program_id(1)
    HW = H * W
    cin1 = gen_ch + cond_ch

    # First diffusion step for this batch element: load initial noise + cond
    # into the persistent VMEM state buffer (rows 0:gen_ch = xt, rest = cond).
    @pl.when(t == 0)
    def _init():
        xcat_sc[0:gen_ch, :] = xt0_ref[0]
        xcat_sc[gen_ch:cin1, :] = cond_ref[0]

    def build_patches(x, cin, dst_ref):
        # Stack the 9 shifted (+ zero-pad masked) copies of x into an im2col
        # patch matrix (9*cin, HW).  Shifts go through the XLU (pltpu.roll);
        # stores land at 8-aligned sublane offsets.
        for k in range(9):
            kh, kw = k // 3, k % 3
            delta = (kh - 1) * W + (kw - 1)
            if delta == 0:
                piece = x
            else:
                piece = pltpu.roll(x, shift=(-delta) % HW, axis=1)
                piece = piece * mask_ref[k]          # zero the wrapped border taps
            dst_ref[k * cin:(k + 1) * cin, :] = piece

    xcat = xcat_sc[...]                              # (cin1, HW)

    # ---- conv1 (3x3, zero pad) as one MXU matmul + fused bias/temb + SiLU ----
    build_patches(xcat, cin1, p1_sc)
    h = jnp.dot(w1_ref[...], p1_sc[...].astype(jnp.bfloat16),
                preferred_element_type=jnp.float32)   # (hidden, HW)
    h = h + b1t_ref[0]                                # b1 + temb(t), (hidden, 1)
    h = h * jax.nn.sigmoid(h)                         # SiLU (EUP)

    # ---- conv2 (3x3, zero pad) as one MXU matmul -> eps ----
    build_patches(h, hidden, p2_sc)
    eps = jnp.dot(w2_ref[...], p2_sc[...].astype(jnp.bfloat16),
                  preferred_element_type=jnp.float32)  # (gen_ch, HW)
    eps = eps + b2_ref[...]

    # ---- fused DDPM reverse update (epilogue) ----
    c1 = coef_ref[t, 0]
    c2 = coef_ref[t, 1]
    sigma = coef_ref[t, 2]
    xt = xcat[0:gen_ch, :]
    xt_new = c1 * (xt - c2 * eps) + sigma * z_ref[0, 0]
    xcat_sc[0:gen_ch, :] = xt_new                      # carry state to next step

    @pl.when(t == num_steps - 1)
    def _finish():
        out_ref[0] = xt_new


# ----------------------------------------------------------------------------
# Parameter construction (deterministic, in-script).
# ----------------------------------------------------------------------------
def init_params(key, gen_ch, cond_ch, hidden, temb_dim):
    k1, k2, k3 = jax.random.split(key, 3)
    cin1 = gen_ch + cond_ch
    return {
        "w1": 0.05 * jax.random.normal(k1, (3, 3, cin1, hidden), jnp.float32),
        "b1": jnp.zeros((hidden,), jnp.float32),
        "w2": 0.05 * jax.random.normal(k2, (3, 3, hidden, gen_ch), jnp.float32),
        "b2": jnp.zeros((gen_ch,), jnp.float32),
        "wt": 0.05 * jax.random.normal(k3, (temb_dim, hidden), jnp.float32),
    }


# ----------------------------------------------------------------------------
# LFD forward: x -> vae (Identity) -> forecast (Identity) -> diffusion sampling
# ----------------------------------------------------------------------------
@functools.partial(jax.jit, static_argnames=("num_steps", "temb_dim", "gen_ch"))
def lfd_forward(params, x_nchw, noise_key, *, num_steps, temb_dim, gen_ch):
    # vae = nn.Identity(), forecast = nn.Identity()
    cond_nchw = x_nchw
    B, cond_ch, H, W = cond_nchw.shape
    HW = H * W
    hidden = params["w1"].shape[-1]
    cin1 = gen_ch + cond_ch

    cond = cond_nchw.reshape(B, cond_ch, HW).astype(jnp.float32)

    # --- DDPM schedule, precomputed once, ordered by reverse time (t -> i=T-1-t)
    betas = jnp.linspace(1e-4, 2e-2, num_steps, dtype=jnp.float32)
    alphas = 1.0 - betas
    alpha_bars = jnp.cumprod(alphas)
    c1 = 1.0 / jnp.sqrt(alphas)
    c2 = betas / jnp.sqrt(1.0 - alpha_bars)
    sigma = jnp.sqrt(betas).at[0].set(0.0)
    coef = jnp.stack([c1, c2, sigma], axis=1)[::-1]            # (T, 3), SMEM

    # --- timestep-embedding bias table, reverse time order: b1 + temb(i) @ wt
    i_rev = jnp.arange(num_steps - 1, -1, -1, dtype=jnp.float32)
    half = temb_dim // 2
    freqs = jnp.exp(-jnp.log(10000.0) * jnp.arange(half, dtype=jnp.float32) / half)
    args = i_rev[:, None] * freqs[None, :]
    tembs = jnp.concatenate([jnp.sin(args), jnp.cos(args)], axis=1)   # (T, temb)
    b1_table = (params["b1"][None, :] + tembs @ params["wt"])[:, :, None]  # (T,hidden,1)

    # --- im2col weight matrices (bf16 MXU operands, f32 accumulation in-kernel)
    w1m = params["w1"].reshape(9 * cin1, hidden).T.astype(jnp.bfloat16)    # (hidden, 9*cin1)
    w2m = params["w2"].reshape(9 * hidden, gen_ch).T.astype(jnp.bfloat16)  # (gen_ch, 9*hidden)
    b2 = params["b2"][:, None]                                             # (gen_ch, 1)

    # --- zero-pad border masks for the 9 taps (valid-neighbour indicator)
    pidx = jnp.arange(HW, dtype=jnp.int32)
    hh = pidx // W
    ww = pidx % W
    mask_list = []
    for kh in range(3):
        for kw in range(3):
            dh, dw = kh - 1, kw - 1
            valid = ((hh + dh >= 0) & (hh + dh < H) &
                     (ww + dw >= 0) & (ww + dw < W))
            mask_list.append(valid)
    masks = jnp.stack(mask_list).astype(jnp.float32).reshape(9, 1, HW)

    # --- all noise generated once up front
    k0, kz = jax.random.split(noise_key)
    xt0 = jax.random.normal(k0, (B, gen_ch, HW), jnp.float32)
    z = jax.random.normal(kz, (B, num_steps, gen_ch, HW), jnp.float32)

    kernel = functools.partial(
        _lfd_fused_kernel, H=H, W=W, gen_ch=gen_ch, cond_ch=cond_ch,
        hidden=hidden, num_steps=num_steps)

    out_flat = pl.pallas_call(
        kernel,
        out_shape=jax.ShapeDtypeStruct((B, gen_ch, HW), jnp.float32),
        grid_spec=pltpu.PrefetchScalarGridSpec(
            num_scalar_prefetch=0,
            grid=(B, num_steps),
            in_specs=[
                pl.BlockSpec(memory_space=pltpu.MemorySpace.SMEM),          # coef (T,3)
                pl.BlockSpec((1, gen_ch, HW), lambda b, t: (b, 0, 0)),      # xt0
                pl.BlockSpec((1, cond_ch, HW), lambda b, t: (b, 0, 0)),     # cond
                pl.BlockSpec((9, 1, HW), lambda b, t: (0, 0, 0)),           # border masks
                pl.BlockSpec((hidden, 9 * cin1), lambda b, t: (0, 0)),      # w1 (im2col)
                pl.BlockSpec((gen_ch, 9 * hidden), lambda b, t: (0, 0)),    # w2 (im2col)
                pl.BlockSpec((1, hidden, 1), lambda b, t: (t, 0, 0)),       # b1 + temb(t)
                pl.BlockSpec((gen_ch, 1), lambda b, t: (0, 0)),             # b2
                pl.BlockSpec((1, 1, gen_ch, HW), lambda b, t: (b, t, 0, 0)),# noise z[b,t]
            ],
            out_specs=pl.BlockSpec((1, gen_ch, HW), lambda b, t: (b, 0, 0)),
            scratch_shapes=[
                pltpu.VMEM((cin1, HW), jnp.float32),        # xt ++ cond (loop state)
                pltpu.VMEM((9 * cin1, HW), jnp.float32),    # conv1 im2col patches
                pltpu.VMEM((9 * hidden, HW), jnp.float32),  # conv2 im2col patches
            ]),
        compiler_params=pltpu.CompilerParams(
            dimension_semantics=("parallel", "arbitrary")),
    )(coef, xt0, cond, masks, w1m, w2m, b1_table, b2, z)

    return out_flat.reshape(B, gen_ch, H, W)        # NCHW


if __name__ == "__main__":
    # model_config analogue: image_size=16, conditioning_channels=4,
    # generated_channels=4, hidden=32, 4 diffusion steps.
    B, C, Hs, Ws = 2, 4, 16, 16
    GEN_CH, COND_CH, HIDDEN, TEMB, T = 4, 4, 32, 32, 4

    root = jax.random.PRNGKey(0)
    k_x, k_p, k_n = jax.random.split(root, 3)

    x = jax.random.normal(k_x, (B, C, Hs, Ws), jnp.float32)     # NCHW input
    params = init_params(k_p, GEN_CH, COND_CH, HIDDEN, TEMB)

    out = lfd_forward(params, x, k_n, num_steps=T, temb_dim=TEMB, gen_ch=GEN_CH)
    out = jax.block_until_ready(out)
    assert out.shape == (B, GEN_CH, Hs, Ws), out.shape
    assert jnp.all(jnp.isfinite(out))
    print("KERNEL_OK")
</pallas_src>

<mosaic_0001>
module attributes {stable_mosaic.version = 11 : i64} {
  func.func @_lfd_fused_kernel(%arg0: i32, %arg1: i32, %arg2: memref<4x3xf32, #tpu.memory_space<smem>>, %arg3: memref<1x4x256xf32, #tpu.memory_space<vmem>>, %arg4: memref<1x4x256xf32, #tpu.memory_space<vmem>>, %arg5: memref<9x1x256xf32, #tpu.memory_space<vmem>>, %arg6: memref<32x72xbf16, #tpu.memory_space<vmem>>, %arg7: memref<4x288xbf16, #tpu.memory_space<vmem>>, %arg8: memref<1x32x1xf32, #tpu.memory_space<vmem>>, %arg9: memref<4x1xf32, #tpu.memory_space<vmem>>, %arg10: memref<1x1x4x256xf32, #tpu.memory_space<vmem>>, %arg11: memref<1x4x256xf32, #tpu.memory_space<vmem>>, %arg12: memref<8x256xf32, #tpu.memory_space<vmem>>, %arg13: memref<72x256xf32, #tpu.memory_space<vmem>>, %arg14: memref<288x256xf32, #tpu.memory_space<vmem>>) attributes {dimension_semantics = [#tpu.dimension_semantics<parallel>, #tpu.dimension_semantics<arbitrary>], iteration_bounds = array<i64: 2, 4>, scalar_prefetch = 0 : i64, scratch_operands = 3 : i64, tpu.core_type = #tpu.core_type<tc>, window_params = [{transform_indices = @transform_0, window_bounds = array<i64: 4, 3>}, {transform_indices = @transform_1, window_bounds = array<i64: 1, 4, 256>}, {transform_indices = @transform_2, window_bounds = array<i64: 1, 4, 256>}, {pipeline_mode = #tpu.pipeline_mode<synchronous>, transform_indices = @transform_3, window_bounds = array<i64: 9, 1, 256>}, {pipeline_mode = #tpu.pipeline_mode<synchronous>, transform_indices = @transform_4, window_bounds = array<i64: 32, 72>}, {pipeline_mode = #tpu.pipeline_mode<synchronous>, transform_indices = @transform_5, window_bounds = array<i64: 4, 288>}, {transform_indices = @transform_6, window_bounds = array<i64: 1, 32, 1>}, {pipeline_mode = #tpu.pipeline_mode<synchronous>, transform_indices = @transform_7, window_bounds = array<i64: 4, 1>}, {transform_indices = @transform_8, window_bounds = array<i64: 1, 1, 4, 256>}, {transform_indices = @transform_9, window_bounds = array<i64: 1, 4, 256>}]} {
    %c0_i32 = arith.constant 0 : i32
    %0 = arith.cmpi eq, %arg1, %c0_i32 : i32
    %1 = arith.extui %0 : i1 to i32
    %c0_i32_0 = arith.constant 0 : i32
    %2 = arith.cmpi ne, %1, %c0_i32_0 : i32
    scf.if %2 {
      %c0_99 = arith.constant 0 : index
      %c0_100 = arith.constant 0 : index
      %c0_101 = arith.constant 0 : index
      %144 = vector.load %arg3[%c0_99, %c0_100, %c0_101] : memref<1x4x256xf32, #tpu.memory_space<vmem>>, vector<1x4x256xf32>
      %145 = vector.shape_cast %144 : vector<1x4x256xf32> to vector<4x256xf32>
      %c0_102 = arith.constant 0 : index
      %c0_103 = arith.constant 0 : index
      %146 = vector.load %arg12[%c0_102, %c0_103] : memref<8x256xf32, #tpu.memory_space<vmem>>, vector<4x256xf32>
      tpu.vector_store %arg12[%c0_102, %c0_103], %145 {strides = array<i32>} : memref<8x256xf32, #tpu.memory_space<vmem>>, vector<4x256xf32>,
      %c0_104 = arith.constant 0 : index
      %c0_105 = arith.constant 0 : index
      %c0_106 = arith.constant 0 : index
      %147 = vector.load %arg4[%c0_104, %c0_105, %c0_106] : memref<1x4x256xf32, #tpu.memory_space<vmem>>, vector<1x4x256xf32>
      %148 = vector.shape_cast %147 : vector<1x4x256xf32> to vector<4x256xf32>
      %c4 = arith.constant 4 : index
      %c0_107 = arith.constant 0 : index
      %149 = vector.load %arg12[%c4, %c0_107] : memref<8x256xf32, #tpu.memory_space<vmem>>, vector<4x256xf32>
      tpu.vector_store %arg12[%c4, %c0_107], %148 {strides = array<i32>} : memref<8x256xf32, #tpu.memory_space<vmem>>, vector<4x256xf32>,
    } else {
    }
    %c0 = arith.constant 0 : index
    %c0_1 = arith.constant 0 : index
    %3 = vector.load %arg12[%c0, %c0_1] : memref<8x256xf32, #tpu.memory_space<vmem>>, vector<8x256xf32>
    %c17_i32 = arith.constant 17 : i32
    %4 = tpu.dynamic_rotate %3 by %c17_i32 dim 1 : vector<8x256xf32>, i32 -> vector<8x256xf32>
    %c0_2 = arith.constant 0 : index
    %c0_3 = arith.constant 0 : index
    %c0_4 = arith.constant 0 : index
    %5 = vector.load %arg5[%c0_2, %c0_3, %c0_4] : memref<9x1x256xf32, #tpu.memory_space<vmem>>, vector<1x1x256xf32>
    %6 = vector.shape_cast %5 : vector<1x1x256xf32> to vector<1x256xf32>
    %7 = vector.broadcast %6 : vector<1x256xf32> to vector<8x256xf32>
    %8 = arith.mulf %4, %7 : vector<8x256xf32>
    %c0_5 = arith.constant 0 : index
    %c0_6 = arith.constant 0 : index
    %9 = vector.load %arg13[%c0_5, %c0_6] : memref<72x256xf32, #tpu.memory_space<vmem>>, vector<8x256xf32>
    tpu.vector_store %arg13[%c0_5, %c0_6], %8 {strides = array<i32>} : memref<72x256xf32, #tpu.memory_space<vmem>>, vector<8x256xf32>,
    %c16_i32 = arith.constant 16 : i32
    %10 = tpu.dynamic_rotate %3 by %c16_i32 dim 1 : vector<8x256xf32>, i32 -> vector<8x256xf32>
    %c1 = arith.constant 1 : index
    %c0_7 = arith.constant 0 : index
    %c0_8 = arith.constant 0 : index
    %11 = vector.load %arg5[%c1, %c0_7, %c0_8] : memref<9x1x256xf32, #tpu.memory_space<vmem>>, vector<1x1x256xf32>
    %12 = vector.shape_cast %11 : vector<1x1x256xf32> to vector<1x256xf32>
    %13 = vector.broadcast %12 : vector<1x256xf32> to vector<8x256xf32>
    %14 = arith.mulf %10, %13 : vector<8x256xf32>
    %c8 = arith.constant 8 : index
    %c0_9 = arith.constant 0 : index
    %15 = vector.load %arg13[%c8, %c0_9] : memref<72x256xf32, #tpu.memory_space<vmem>>, vector<8x256xf32>
    tpu.vector_store %arg13[%c8, %c0_9], %14 {strides = array<i32>} : memref<72x256xf32, #tpu.memory_space<vmem>>, vector<8x256xf32>,
    %c15_i32 = arith.constant 15 : i32
    %16 = tpu.dynamic_rotate %3 by %c15_i32 dim 1 : vector<8x256xf32>, i32 -> vector<8x256xf32>
    %c2 = arith.constant 2 : index
    %c0_10 = arith.constant 0 : index
    %c0_11 = arith.constant 0 : index
    %17 = vector.load %arg5[%c2, %c0_10, %c0_11] : memref<9x1x256xf32, #tpu.memory_space<vmem>>, vector<1x1x256xf32>
    %18 = vector.shape_cast %17 : vector<1x1x256xf32> to vector<1x256xf32>
    %19 = vector.broadcast %18 : vector<1x256xf32> to vector<8x256xf32>
    %20 = arith.mulf %16, %19 : vector<8x256xf32>
    %c16 = arith.constant 16 : index
    %c0_12 = arith.constant 0 : index
    %21 = vector.load %arg13[%c16, %c0_12] : memref<72x256xf32, #tpu.memory_space<vmem>>, vector<8x256xf32>
    tpu.vector_store %arg13[%c16, %c0_12], %20 {strides = array<i32>} : memref<72x256xf32, #tpu.memory_space<vmem>>, vector<8x256xf32>,
    %c1_i32 = arith.constant 1 : i32
    %22 = tpu.dynamic_rotate %3 by %c1_i32 dim 1 : vector<8x256xf32>, i32 -> vector<8x256xf32>
    %c3 = arith.constant 3 : index
    %c0_13 = arith.constant 0 : index
    %c0_14 = arith.constant 0 : index
    %23 = vector.load %arg5[%c3, %c0_13, %c0_14] : memref<9x1x256xf32, #tpu.memory_space<vmem>>, vector<1x1x256xf32>
    %24 = vector.shape_cast %23 : vector<1x1x256xf32> to vector<1x256xf32>
    %25 = vector.broadcast %24 : vector<1x256xf32> to vector<8x256xf32>
    %26 = arith.mulf %22, %25 : vector<8x256xf32>
    %c24 = arith.constant 24 : index
    %c0_15 = arith.constant 0 : index
    %27 = vector.load %arg13[%c24, %c0_15] : memref<72x256xf32, #tpu.memory_space<vmem>>, vector<8x256xf32>
    tpu.vector_store %arg13[%c24, %c0_15], %26 {strides = array<i32>} : memref<72x256xf32, #tpu.memory_space<vmem>>, vector<8x256xf32>,
    %c32 = arith.constant 32 : index
    %c0_16 = arith.constant 0 : index
    %28 = vector.load %arg13[%c32, %c0_16] : memref<72x256xf32, #tpu.memory_space<vmem>>, vector<8x256xf32>
    tpu.vector_store %arg13[%c32, %c0_16], %3 {strides = array<i32>} : memref<72x256xf32, #tpu.memory_space<vmem>>, vector<8x256xf32>,
    %c255_i32 = arith.constant 255 : i32
    %29 = tpu.dynamic_rotate %3 by %c255_i32 dim 1 : vector<8x256xf32>, i32 -> vector<8x256xf32>
    %c5 = arith.constant 5 : index
    %c0_17 = arith.constant 0 : index
    %c0_18 = arith.constant 0 : index
    %30 = vector.load %arg5[%c5, %c0_17, %c0_18] : memref<9x1x256xf32, #tpu.memory_space<vmem>>, vector<1x1x256xf32>
    %31 = vector.shape_cast %30 : vector<1x1x256xf32> to vector<1x256xf32>
    %32 = vector.broadcast %31 : vector<1x256xf32> to vector<8x256xf32>
    %33 = arith.mulf %29, %32 : vector<8x256xf32>
    %c40 = arith.constant 40 : index
    %c0_19 = arith.constant 0 : index
    %34 = vector.load %arg13[%c40, %c0_19] : memref<72x256xf32, #tpu.memory_space<vmem>>, vector<8x256xf32>
    tpu.vector_store %arg13[%c40, %c0_19], %33 {strides = array<i32>} : memref<72x256xf32, #tpu.memory_space<vmem>>, vector<8x256xf32>,
    %c241_i32 = arith.constant 241 : i32
    %35 = tpu.dynamic_rotate %3 by %c241_i32 dim 1 : vector<8x256xf32>, i32 -> vector<8x256xf32>
    %c6 = arith.constant 6 : index
    %c0_20 = arith.constant 0 : index
    %c0_21 = arith.constant 0 : index
    %36 = vector.load %arg5[%c6, %c0_20, %c0_21] : memref<9x1x256xf32, #tpu.memory_space<vmem>>, vector<1x1x256xf32>
    %37 = vector.shape_cast %36 : vector<1x1x256xf32> to vector<1x256xf32>
    %38 = vector.broadcast %37 : vector<1x256xf32> to vector<8x256xf32>
    %39 = arith.mulf %35, %38 : vector<8x256xf32>
    %c48 = arith.constant 48 : index
    %c0_22 = arith.constant 0 : index
    %40 = vector.load %arg13[%c48, %c0_22] : memref<72x256xf32, #tpu.memory_space<vmem>>, vector<8x256xf32>
    tpu.vector_store %arg13[%c48, %c0_22], %39 {strides = array<i32>} : memref<72x256xf32, #tpu.memory_space<vmem>>, vector<8x256xf32>,
    %c240_i32 = arith.constant 240 : i32
    %41 = tpu.dynamic_rotate %3 by %c240_i32 dim 1 : vector<8x256xf32>, i32 -> vector<8x256xf32>
    %c7 = arith.constant 7 : index
    %c0_23 = arith.constant 0 : index
    %c0_24 = arith.constant 0 : index
    %42 = vector.load %arg5[%c7, %c0_23, %c0_24] : memref<9x1x256xf32, #tpu.memory_space<vmem>>, vector<1x1x256xf32>
    %43 = vector.shape_cast %42 : vector<1x1x256xf32> to vector<1x256xf32>
    %44 = vector.broadcast %43 : vector<1x256xf32> to vector<8x256xf32>
    %45 = arith.mulf %41, %44 : vector<8x256xf32>
    %c56 = arith.constant 56 : index
    %c0_25 = arith.constant 0 : index
    %46 = vector.load %arg13[%c56, %c0_25] : memref<72x256xf32, #tpu.memory_space<vmem>>, vector<8x256xf32>
    tpu.vector_store %arg13[%c56, %c0_25], %45 {strides = array<i32>} : memref<72x256xf32, #tpu.memory_space<vmem>>, vector<8x256xf32>,
    %c239_i32 = arith.constant 239 : i32
    %47 = tpu.dynamic_rotate %3 by %c239_i32 dim 1 : vector<8x256xf32>, i32 -> vector<8x256xf32>
    %c8_26 = arith.constant 8 : index
    %c0_27 = arith.constant 0 : index
    %c0_28 = arith.constant 0 : index
    %48 = vector.load %arg5[%c8_26, %c0_27, %c0_28] : memref<9x1x256xf32, #tpu.memory_space<vmem>>, vector<1x1x256xf32>
    %49 = vector.shape_cast %48 : vector<1x1x256xf32> to vector<1x256xf32>
    %50 = vector.broadcast %49 : vector<1x256xf32> to vector<8x256xf32>
    %51 = arith.mulf %47, %50 : vector<8x256xf32>
    %c64 = arith.constant 64 : index
    %c0_29 = arith.constant 0 : index
    %52 = vector.load %arg13[%c64, %c0_29] : memref<72x256xf32, #tpu.memory_space<vmem>>, vector<8x256xf32>
    tpu.vector_store %arg13[%c64, %c0_29], %51 {strides = array<i32>} : memref<72x256xf32, #tpu.memory_space<vmem>>, vector<8x256xf32>,
    %c0_30 = arith.constant 0 : index
    %c0_31 = arith.constant 0 : index
    %53 = vector.load %arg6[%c0_30, %c0_31] : memref<32x72xbf16, #tpu.memory_space<vmem>>, vector<32x72xbf16>
    %c0_32 = arith.constant 0 : index
    %c0_33 = arith.constant 0 : index
    %54 = vector.load %arg13[%c0_32, %c0_33] : memref<72x256xf32, #tpu.memory_space<vmem>>, vector<72x256xf32>
    %55 = arith.truncf %54 : vector<72x256xf32> to vector<72x256xbf16>
    %cst = arith.constant dense<0.000000e+00> : vector<32x256xf32>
    %56 = tpu.matmul %53, %55, %cst {dimension_numbers = #tpu.dot_dimension_numbers<[1], [0], [0], [1], [0, 0, 1, 1], [], []>} : vector<32x72xbf16>, vector<72x256xbf16>, vector<32x256xf32> -> vector<32x256xf32>
    %c0_34 = arith.constant 0 : index
    %c0_35 = arith.constant 0 : index
    %c0_36 = arith.constant 0 : index
    %57 = vector.load %arg8[%c0_34, %c0_35, %c0_36] : memref<1x32x1xf32, #tpu.memory_space<vmem>>, vector<1x32x1xf32>
    %58 = vector.shape_cast %57 : vector<1x32x1xf32> to vector<32x1xf32>
    %59 = vector.broadcast %58 : vector<32x1xf32> to vector<32x256xf32>
    %60 = arith.addf %56, %59 : vector<32x256xf32>
    %61 = arith.negf %60 : vector<32x256xf32>
    %62 = math.exp %61 : vector<32x256xf32>
    %cst_37 = arith.constant 1.000000e+00 : f32
    %63 = vector.broadcast %cst_37 : f32 to vector<32x256xf32>
    %64 = arith.addf %63, %62 : vector<32x256xf32>
    %65 = arith.divf %63, %64 : vector<32x256xf32>
    %66 = arith.mulf %60, %65 : vector<32x256xf32>
    %c17_i32_38 = arith.constant 17 : i32
    %67 = tpu.dynamic_rotate %66 by %c17_i32_38 dim 1 : vector<32x256xf32>, i32 -> vector<32x256xf32>
    %c0_39 = arith.constant 0 : index
    %c0_40 = arith.constant 0 : index
    %c0_41 = arith.constant 0 : index
    %68 = vector.load %arg5[%c0_39, %c0_40, %c0_41] : memref<9x1x256xf32, #tpu.memory_space<vmem>>, vector<1x1x256xf32>
    %69 = vector.shape_cast %68 : vector<1x1x256xf32> to vector<1x256xf32>
    %70 = vector.broadcast %69 : vector<1x256xf32> to vector<32x256xf32>
    %71 = arith.mulf %67, %70 : vector<32x256xf32>
    %c0_42 = arith.constant 0 : index
    %c0_43 = arith.constant 0 : index
    %72 = vector.load %arg14[%c0_42, %c0_43] : memref<288x256xf32, #tpu.memory_space<vmem>>, vector<32x256xf32>
    tpu.vector_store %arg14[%c0_42, %c0_43], %71 {strides = array<i32>} : memref<288x256xf32, #tpu.memory_space<vmem>>, vector<32x256xf32>,
    %c16_i32_44 = arith.constant 16 : i32
    %73 = tpu.dynamic_rotate %66 by %c16_i32_44 dim 1 : vector<32x256xf32>, i32 -> vector<32x256xf32>
    %c1_45 = arith.constant 1 : index
    %c0_46 = arith.constant 0 : index
    %c0_47 = arith.constant 0 : index
    %74 = vector.load %arg5[%c1_45, %c0_46, %c0_47] : memref<9x1x256xf32, #tpu.memory_space<vmem>>, vector<1x1x256xf32>
    %75 = vector.shape_cast %74 : vector<1x1x256xf32> to vector<1x256xf32>
    %76 = vector.broadcast %75 : vector<1x256xf32> to vector<32x256xf32>
    %77 = arith.mulf %73, %76 : vector<32x256xf32>
    %c32_48 = arith.constant 32 : index
    %c0_49 = arith.constant 0 : index
    %78 = vector.load %arg14[%c32_48, %c0_49] : memref<288x256xf32, #tpu.memory_space<vmem>>, vector<32x256xf32>
    tpu.vector_store %arg14[%c32_48, %c0_49], %77 {strides = array<i32>} : memref<288x256xf32, #tpu.memory_space<vmem>>, vector<32x256xf32>,
    %c15_i32_50 = arith.constant 15 : i32
    %79 = tpu.dynamic_rotate %66 by %c15_i32_50 dim 1 : vector<32x256xf32>, i32 -> vector<32x256xf32>
    %c2_51 = arith.constant 2 : index
    %c0_52 = arith.constant 0 : index
    %c0_53 = arith.constant 0 : index
    %80 = vector.load %arg5[%c2_51, %c0_52, %c0_53] : memref<9x1x256xf32, #tpu.memory_space<vmem>>, vector<1x1x256xf32>
    %81 = vector.shape_cast %80 : vector<1x1x256xf32> to vector<1x256xf32>
    %82 = vector.broadcast %81 : vector<1x256xf32> to vector<32x256xf32>
    %83 = arith.mulf %79, %82 : vector<32x256xf32>
    %c64_54 = arith.constant 64 : index
    %c0_55 = arith.constant 0 : index
    %84 = vector.load %arg14[%c64_54, %c0_55] : memref<288x256xf32, #tpu.memory_space<vmem>>, vector<32x256xf32>
    tpu.vector_store %arg14[%c64_54, %c0_55], %83 {strides = array<i32>} : memref<288x256xf32, #tpu.memory_space<vmem>>, vector<32x256xf32>,
    %c1_i32_56 = arith.constant 1 : i32
    %85 = tpu.dynamic_rotate %66 by %c1_i32_56 dim 1 : vector<32x256xf32>, i32 -> vector<32x256xf32>
    %c3_57 = arith.constant 3 : index
    %c0_58 = arith.constant 0 : index
    %c0_59 = arith.constant 0 : index
    %86 = vector.load %arg5[%c3_57, %c0_58, %c0_59] : memref<9x1x256xf32, #tpu.memory_space<vmem>>, vector<1x1x256xf32>
    %87 = vector.shape_cast %86 : vector<1x1x256xf32> to vector<1x256xf32>
    %88 = vector.broadcast %87 : vector<1x256xf32> to vector<32x256xf32>
    %89 = arith.mulf %85, %88 : vector<32x256xf32>
    %c96 = arith.constant 96 : index
    %c0_60 = arith.constant 0 : index
    %90 = vector.load %arg14[%c96, %c0_60] : memref<288x256xf32, #tpu.memory_space<vmem>>, vector<32x256xf32>
    tpu.vector_store %arg14[%c96, %c0_60], %89 {strides = array<i32>} : memref<288x256xf32, #tpu.memory_space<vmem>>, vector<32x256xf32>,
    %c128 = arith.constant 128 : index
    %c0_61 = arith.constant 0 : index
    %91 = vector.load %arg14[%c128, %c0_61] : memref<288x256xf32, #tpu.memory_space<vmem>>, vector<32x256xf32>
    tpu.vector_store %arg14[%c128, %c0_61], %66 {strides = array<i32>} : memref<288x256xf32, #tpu.memory_space<vmem>>, vector<32x256xf32>,
    %c255_i32_62 = arith.constant 255 : i32
    %92 = tpu.dynamic_rotate %66 by %c255_i32_62 dim 1 : vector<32x256xf32>, i32 -> vector<32x256xf32>
    %c5_63 = arith.constant 5 : index
    %c0_64 = arith.constant 0 : index
    %c0_65 = arith.constant 0 : index
    %93 = vector.load %arg5[%c5_63, %c0_64, %c0_65] : memref<9x1x256xf32, #tpu.memory_space<vmem>>, vector<1x1x256xf32>
    %94 = vector.shape_cast %93 : vector<1x1x256xf32> to vector<1x256xf32>
    %95 = vector.broadcast %94 : vector<1x256xf32> to vector<32x256xf32>
    %96 = arith.mulf %92, %95 : vector<32x256xf32>
    %c160 = arith.constant 160 : index
    %c0_66 = arith.constant 0 : index
    %97 = vector.load %arg14[%c160, %c0_66] : memref<288x256xf32, #tpu.memory_space<vmem>>, vector<32x256xf32>
    tpu.vector_store %arg14[%c160, %c0_66], %96 {strides = array<i32>} : memref<288x256xf32, #tpu.memory_space<vmem>>, vector<32x256xf32>,
    %c241_i32_67 = arith.constant 241 : i32
    %98 = tpu.dynamic_rotate %66 by %c241_i32_67 dim 1 : vector<32x256xf32>, i32 -> vector<32x256xf32>
    %c6_68 = arith.constant 6 : index
    %c0_69 = arith.constant 0 : index
    %c0_70 = arith.constant 0 : index
    %99 = vector.load %arg5[%c6_68, %c0_69, %c0_70] : memref<9x1x256xf32, #tpu.memory_space<vmem>>, vector<1x1x256xf32>
    %100 = vector.shape_cast %99 : vector<1x1x256xf32> to vector<1x256xf32>
    %101 = vector.broadcast %100 : vector<1x256xf32> to vector<32x256xf32>
    %102 = arith.mulf %98, %101 : vector<32x256xf32>
    %c192 = arith.constant 192 : index
    %c0_71 = arith.constant 0 : index
    %103 = vector.load %arg14[%c192, %c0_71] : memref<288x256xf32, #tpu.memory_space<vmem>>, vector<32x256xf32>
    tpu.vector_store %arg14[%c192, %c0_71], %102 {strides = array<i32>} : memref<288x256xf32, #tpu.memory_space<vmem>>, vector<32x256xf32>,
    %c240_i32_72 = arith.constant 240 : i32
    %104 = tpu.dynamic_rotate %66 by %c240_i32_72 dim 1 : vector<32x256xf32>, i32 -> vector<32x256xf32>
    %c7_73 = arith.constant 7 : index
    %c0_74 = arith.constant 0 : index
    %c0_75 = arith.constant 0 : index
    %105 = vector.load %arg5[%c7_73, %c0_74, %c0_75] : memref<9x1x256xf32, #tpu.memory_space<vmem>>, vector<1x1x256xf32>
    %106 = vector.shape_cast %105 : vector<1x1x256xf32> to vector<1x256xf32>
    %107 = vector.broadcast %106 : vector<1x256xf32> to vector<32x256xf32>
    %108 = arith.mulf %104, %107 : vector<32x256xf32>
    %c224 = arith.constant 224 : index
    %c0_76 = arith.constant 0 : index
    %109 = vector.load %arg14[%c224, %c0_76] : memref<288x256xf32, #tpu.memory_space<vmem>>, vector<32x256xf32>
    tpu.vector_store %arg14[%c224, %c0_76], %108 {strides = array<i32>} : memref<288x256xf32, #tpu.memory_space<vmem>>, vector<32x256xf32>,
    %c239_i32_77 = arith.constant 239 : i32
    %110 = tpu.dynamic_rotate %66 by %c239_i32_77 dim 1 : vector<32x256xf32>, i32 -> vector<32x256xf32>
    %c8_78 = arith.constant 8 : index
    %c0_79 = arith.constant 0 : index
    %c0_80 = arith.constant 0 : index
    %111 = vector.load %arg5[%c8_78, %c0_79, %c0_80] : memref<9x1x256xf32, #tpu.memory_space<vmem>>, vector<1x1x256xf32>
    %112 = vector.shape_cast %111 : vector<1x1x256xf32> to vector<1x256xf32>
    %113 = vector.broadcast %112 : vector<1x256xf32> to vector<32x256xf32>
    %114 = arith.mulf %110, %113 : vector<32x256xf32>
    %c256 = arith.constant 256 : index
    %c0_81 = arith.constant 0 : index
    %115 = vector.load %arg14[%c256, %c0_81] : memref<288x256xf32, #tpu.memory_space<vmem>>, vector<32x256xf32>
    tpu.vector_store %arg14[%c256, %c0_81], %114 {strides = array<i32>} : memref<288x256xf32, #tpu.memory_space<vmem>>, vector<32x256xf32>,
    %c0_82 = arith.constant 0 : index
    %c0_83 = arith.constant 0 : index
    %116 = vector.load %arg7[%c0_82, %c0_83] : memref<4x288xbf16, #tpu.memory_space<vmem>>, vector<4x288xbf16>
    %c0_84 = arith.constant 0 : index
    %c0_85 = arith.constant 0 : index
    %117 = vector.load %arg14[%c0_84, %c0_85] : memref<288x256xf32, #tpu.memory_space<vmem>>, vector<288x256xf32>
    %118 = arith.truncf %117 : vector<288x256xf32> to vector<288x256xbf16>
    %cst_86 = arith.constant dense<0.000000e+00> : vector<4x256xf32>
    %119 = tpu.matmul %116, %118, %cst_86 {dimension_numbers = #tpu.dot_dimension_numbers<[1], [0], [0], [1], [0, 0, 1, 1], [], []>} : vector<4x288xbf16>, vector<288x256xbf16>, vector<4x256xf32> -> vector<4x256xf32>
    %c0_87 = arith.constant 0 : index
    %c0_88 = arith.constant 0 : index
    %120 = vector.load %arg9[%c0_87, %c0_88] : memref<4x1xf32, #tpu.memory_space<vmem>>, vector<4x1xf32>
    %121 = vector.broadcast %120 : vector<4x1xf32> to vector<4x256xf32>
    %122 = arith.addf %119, %121 : vector<4x256xf32>
    %123 = arith.index_cast %arg1 : i32 to index
    %c0_89 = arith.constant 0 : index
    %124 = memref.load %arg2[%123, %c0_89] : memref<4x3xf32, #tpu.memory_space<smem>>
    %125 = arith.index_cast %arg1 : i32 to index
    %c1_90 = arith.constant 1 : index
    %126 = memref.load %arg2[%125, %c1_90] : memref<4x3xf32, #tpu.memory_space<smem>>
    %127 = arith.index_cast %arg1 : i32 to index
    %c2_91 = arith.constant 2 : index
    %128 = memref.load %arg2[%127, %c2_91] : memref<4x3xf32, #tpu.memory_space<smem>>
    %129 = vector.extract_strided_slice %3 {offsets = [0, 0], sizes = [4, 256], strides = [1, 1]} : vector<8x256xf32> to vector<4x256xf32>
    %130 = vector.broadcast %126 : f32 to vector<4x256xf32>
    %131 = arith.mulf %130, %122 : vector<4x256xf32>
    %132 = arith.subf %129, %131 : vector<4x256xf32>
    %133 = vector.broadcast %124 : f32 to vector<4x256xf32>
    %134 = arith.mulf %133, %132 : vector<4x256xf32>
    %c0_92 = arith.constant 0 : index
    %c0_93 = arith.constant 0 : index
    %c0_94 = arith.constant 0 : index
    %c0_95 = arith.constant 0 : index
    %135 = vector.load %arg10[%c0_92, %c0_93, %c0_94, %c0_95] : memref<1x1x4x256xf32, #tpu.memory_space<vmem>>, vector<1x1x4x256xf32>
    %136 = vector.shape_cast %135 : vector<1x1x4x256xf32> to vector<4x256xf32>
    %137 = vector.broadcast %128 : f32 to vector<4x256xf32>
    %138 = arith.mulf %137, %136 : vector<4x256xf32>
    %139 = arith.addf %134, %138 : vector<4x256xf32>
    %c0_96 = arith.constant 0 : index
    %c0_97 = arith.constant 0 : index
    %140 = vector.load %arg12[%c0_96, %c0_97] : memref<8x256xf32, #tpu.memory_space<vmem>>, vector<4x256xf32>
    tpu.vector_store %arg12[%c0_96, %c0_97], %139 {strides = array<i32>} : memref<8x256xf32, #tpu.memory_space<vmem>>, vector<4x256xf32>,
    %c3_i32 = arith.constant 3 : i32
    %141 = arith.cmpi eq, %arg1, %c3_i32 : i32
    %142 = arith.extui %141 : i1 to i32
    %c0_i32_98 = arith.constant 0 : i32
    %143 = arith.cmpi ne, %142, %c0_i32_98 : i32
    scf.if %143 {
      %c0_99 = arith.constant 0 : index
      %c0_100 = arith.constant 0 : index
      %c0_101 = arith.constant 0 : index
      %144 = vector.load %arg11[%c0_99, %c0_100, %c0_101] : memref<1x4x256xf32, #tpu.memory_space<vmem>>, vector<1x4x256xf32>
      %145 = vector.shape_cast %144 : vector<1x4x256xf32> to vector<4x256xf32>
      %146 = vector.shape_cast %139 : vector<4x256xf32> to vector<1x4x256xf32>
      tpu.vector_store %arg11[%c0_99, %c0_100, %c0_101], %146 {strides = array<i32>} : memref<1x4x256xf32, #tpu.memory_space<vmem>>, vector<1x4x256xf32>,
    } else {
    }
    return
  }
  func.func @transform_0(%arg0: i32, %arg1: i32) -> (i32, i32) {
    %c0_i32 = arith.constant 0 : i32
    %c0_i32_0 = arith.constant 0 : i32
    %c0_i32_1 = arith.constant 0 : i32
    return %c0_i32, %c0_i32_0 : i32, i32
  }
  func.func @transform_1(%arg0: i32, %arg1: i32) -> (i32, i32, i32) {
    %c0_i32 = arith.constant 0 : i32
    %c0_i32_0 = arith.constant 0 : i32
    %c0_i32_1 = arith.constant 0 : i32
    return %arg0, %c0_i32, %c0_i32_0 : i32, i32, i32
  }
  func.func @transform_2(%arg0: i32, %arg1: i32) -> (i32, i32, i32) {
    %c0_i32 = arith.constant 0 : i32
    %c0_i32_0 = arith.constant 0 : i32
    %c0_i32_1 = arith.constant 0 : i32
    return %arg0, %c0_i32, %c0_i32_0 : i32, i32, i32
  }
  func.func @transform_3(%arg0: i32, %arg1: i32) -> (i32, i32, i32) {
    %c0_i32 = arith.constant 0 : i32
    %c0_i32_0 = arith.constant 0 : i32
    %c0_i32_1 = arith.constant 0 : i32
    %c0_i32_2 = arith.constant 0 : i32
    return %c0_i32, %c0_i32_0, %c0_i32_1 : i32, i32, i32
  }
  func.func @transform_4(%arg0: i32, %arg1: i32) -> (i32, i32) {
    %c0_i32 = arith.constant 0 : i32
    %c0_i32_0 = arith.constant 0 : i32
    %c0_i32_1 = arith.constant 0 : i32
    return %c0_i32, %c0_i32_0 : i32, i32
  }
  func.func @transform_5(%arg0: i32, %arg1: i32) -> (i32, i32) {
    %c0_i32 = arith.constant 0 : i32
    %c0_i32_0 = arith.constant 0 : i32
    %c0_i32_1 = arith.constant 0 : i32
    return %c0_i32, %c0_i32_0 : i32, i32
  }
  func.func @transform_6(%arg0: i32, %arg1: i32) -> (i32, i32, i32) {
    %c0_i32 = arith.constant 0 : i32
    %c0_i32_0 = arith.constant 0 : i32
    %c0_i32_1 = arith.constant 0 : i32
    return %arg1, %c0_i32, %c0_i32_0 : i32, i32, i32
  }
  func.func @transform_7(%arg0: i32, %arg1: i32) -> (i32, i32) {
    %c0_i32 = arith.constant 0 : i32
    %c0_i32_0 = arith.constant 0 : i32
    %c0_i32_1 = arith.constant 0 : i32
    return %c0_i32, %c0_i32_0 : i32, i32
  }
  func.func @transform_8(%arg0: i32, %arg1: i32) -> (i32, i32, i32, i32) {
    %c0_i32 = arith.constant 0 : i32
    %c0_i32_0 = arith.constant 0 : i32
    %c0_i32_1 = arith.constant 0 : i32
    return %arg0, %arg1, %c0_i32, %c0_i32_0 : i32, i32, i32, i32
  }
  func.func @transform_9(%arg0: i32, %arg1: i32) -> (i32, i32, i32) {
    %c0_i32 = arith.constant 0 : i32
    %c0_i32_0 = arith.constant 0 : i32
    %c0_i32_1 = arith.constant 0 : i32
    return %arg0, %c0_i32, %c0_i32_0 : i32, i32, i32
  }
}

</mosaic_0001>

<bundles_post_ra>
// kernel: lfd_forward.3
= control target key start
LH: loop header
LB: loop body
LE: loop exit
PB: predicated region body
PF: predicated region fallthrough
CT: control target
= control target key end

     0   :  { %s2692_s0 = inlined_call_operand.vmem [shape: f32[4,3], index: 0, kind: input, shape index: {}]   ;;  %s2693_s1 = inlined_call_operand.vmem [shape: f32[2,4,256], index: 1, kind: input, shape index: {}]   ;;  %s2694_s2 = inlined_call_operand.vmem [shape: f32[2,4,256], index: 2, kind: input, shape index: {}]   ;;  %s2695_s3 = inlined_call_operand.vmem [shape: f32[9,1,256], index: 3, kind: input, shape index: {}]   ;;  %s2696_s4 = inlined_call_operand.vmem [shape: bf16[32,72], index: 4, kind: input, shape index: {}]   ;;  %s2697_s5 = inlined_call_operand.vmem [shape: bf16[4,288], index: 5, kind: input, shape index: {}]   ;;  %s2698_s6 = inlined_call_operand.vmem [shape: f32[4,32,1], index: 6, kind: input, shape index: {}]   ;;  %s2699_s7 = inlined_call_operand.vmem [shape: f32[4,1], index: 7, kind: input, shape index: {}]   ;;  %s2700_s8 = inlined_call_operand.vmem [shape: f32[2,4,4,256], index: 8, kind: input, shape index: {}]   ;;  %s2701_s9 = inlined_call_operand.vmem [shape: f32[2,4,256], index: 9, kind: output, shape index: {}]  }
   0x1   :  { %2707 = sst [smem:[#allocation16_spill]] %s2692_s0 }
   0x2   :  { %2708 = sst [smem:[#allocation17_spill]] %s2693_s1 }
   0x3   :  { %14 = vsyncpa [#allocation6], 0  ;;  %s1914_s30 = smov 0   ;;  %s1916_s10 = smov 0  }
   0x4   :  { %s1918_s11 = smov 0   ;;  %s1920_s12 = smov 0  }
   0x5   :  { %s1922_s13 = smov 0  }
   0x6 LB: > { %s1637_s14 = sadd.s32 4294967295, %s1851_s13   ;;  %s29_s15 = sadd.s32 1, %s1843_s11  ;;  %s1851_s13 = sphi %s1922_s13, %s20_s13   ;;  %s1847_s12 = sphi %s1920_s12, %s2741_s12   ;;  %s1843_s11 = sphi %s1918_s11, %s2740_s11   ;;  %s1839_s10 = sphi %s1916_s10, %s2739_s10   ;;  %s1835_s30 = sphi %s1914_s30, %s2738_s30  }
   0x7   : > { %p30_p0 = scmp.ge.s32.totalorder %s29_s15, 4  ;;  %s32_s16 = sadd.s32 1, %s1847_s12 }
   0x8   : > { %p1639_p1 = scmp.ge.s32.totalorder %s1851_s13, 1  ;;  %p274_p2 = scmp.lt.s32.totalorder %s1851_s13, 9 }
   0x9   : > { %s2743_s15 = smov (%p30_p0, %s29_s15), 0  ;;  %s2745_s16 = smov (!%p30_p0, %s32_s16), %s1847_s12 }
   0xa   : > { %2709 = sst [smem:[#allocation8_spill]] %s2743_s15  ;;  %p1947_p3 = pnand %p1639_p1, %p274_p2 }
   0xb   : > { %p34_p4 = scmp.ge.s32.totalorder %s2745_s16, 2  ;;  %p1951_p5 = scmp.eq.s32.totalorder %s1637_s14, 0 }
   0xc   : > { %p1696_p6 = pneg %p1947_p3  ;;  %s2712_s0 = sld [smem:[#allocation16_spill]] }
   0xd   : > { %s2747_s16 = smov (%p34_p4, %s2745_s16), 0 }
   0xe   : > { %2713 = sst [smem:[#allocation9_spill]] %s2747_s16  ;;  %p1697_p7 = pnand %p1951_p5, %p1696_p6 }
  0x10   : > { %p1796_p9 = pneg %p1697_p7 }
  0x12   : > { %s287_s21 = sshll.u32 %s2712_s0, 4  ;;  %s288_s21 = int_to_ptr.vmem [resolvable:$true] %s287_s21 }
  0x13   : > { %s1794_s22 = scalar_lea.vmem %s288_s21, 64  ;;  %p1802_p12 = scmp.lt.s32.totalorder %s288_s21, %s288_s21 }
  0x14   : > { %p1795_p8 = scmp.ne.s32.totalorder %s288_s21, %s1794_s22  ;;  %p1803_p13 = scmp.lt.s32.totalorder %s1794_s22, %s1794_s22 }
  0x16   : > { %p1797_p10 = pnand %p1796_p9, %p1795_p8  ;;  %p1804_p0 = por %p1803_p13, %p1802_p12 }
  0x18   : > { %p1798_p11 = pneg %p1797_p10 }
  0x1a   : > { %p1805_p1 = pnand %p1804_p0, %p1798_p11 }
  0x1c   : > { %1808 = shalt.err (!%p1805_p1)
}
  0x1d   : > { %s1853_s23 = smov [#allocation5]   ;;  %348 = sbr.rel (%p1947_p3) target bundleno = 905 (0x389), region = 56 }
  0x1e   : > { %1699 = dma.vmem_to_smem (!%p1697_p7), %s288_s21, 64, %s1853_s23, [#allocation6]  }
  0x22   : > { %1830 = dma.done.wait (%p1951_p5), [#allocation6], 64  }
  0x23   : > { %1832 = vsyncadd (%p1951_p5), [#allocation6], 4294967232 }
  0x24   : > { %354 = sfence }
  0x25   : > { %p404_p2 = scmp.lt.s32.totalorder %s1839_s10, 1  ;;  %p414_p4 = scmp.lt.s32.totalorder %s1835_s30, 3 }
  0x26   : > { %s2714_s1 = sld [smem:[#allocation17_spill]]  ;;  %p1655_p3 = scmp.ne.s32.totalorder %s1835_s30, 0 }
  0x27   : > { %s2749_s10 = smov (!%p404_p2, %s1839_s10), 1 }
  0x28   : > { %s415_s24 = scalar_select %p414_p4, %s1835_s30, 3 }
  0x29   : > { %s1974_s25 = sshll.u32 %s2749_s10, 3 }
  0x2a   : > { %s413_s17 = scalar_lea.vmem %s2694_s2, %s1974_s25  ;;  %s1690_s18 = sshll.u32 %s415_s24, 5 }
  0x2b   : > { %s1650_s19 = sshll.u32 %s415_s24, 1  ;;  %s1987_s22 = scalar_lea.vmem %s2698_s6, %s1690_s18 }
  0x2c   : > { %s408_s28 = scalar_lea.vmem %s2714_s1, %s1974_s25  ;;  %s425_s10 = sadd.s32 %s1974_s25, %s1650_s19 }
  0x2d   : > { %s1652_s23 = sshll.u32 %s425_s10, 2  ;;  %s432_s26 = scalar_lea.vmem %s2701_s9, %s1974_s25 }
  0x2e   : > { %s1997_s1 = scalar_lea.vmem %s2700_s8, %s1652_s23  ;;  %437 = sbr.rel (%p1655_p3) target bundleno = 56 (0x38), region = 64 }
  0x33   : > { %v438_v0 = vld [vmem:[%s408_s28] sm:$0xff] }
  0x34   : > { %v444_v1 = vld [vmem:[%s413_s17] sm:$0xff]  ;;  %442 = vst [vmem:[#allocation2] sm:$0xf] %v438_v0  ;;  %v440_v2 = vcombine.high %v438_v0, %v438_v0 }
  0x35   : > { %v446_v3 = vcombine.low %v444_v1, %v444_v1  ;;  %449 = vst [vmem:[#allocation2 + $0x8] sm:$0xf0] %v444_v1 }
  0x36   : > { %443 = vst [vmem:[#allocation2 + $0x8] sm:$0xf] %v440_v2 }
  0x37   : > { %448 = vst [vmem:[#allocation2] sm:$0xf0] %v446_v3 }
  0x38 PF: > { %s1854_s0 = smov 113   ;;  %s1855_s15 = smov 111   ;;  %v1860_v6 = vmov 0   ;;  %v682_v7 = vld [vmem:[%s1987_s22 + $0x18] sm:$0xff]  ;;  %v681_v8 = vld [vmem:[%s1987_s22 + $0x10] sm:$0xff]  ;;  %v679_v9 = vld [vmem:[%s1987_s22] sm:$0xff]  ;;  %v456_v11 = vlaneseq }
  0x39   : > { %s1856_s16 = smov 112   ;;  %s1857_s24 = smov 127   ;;  %759 = vmatprep.mubr.bf16.mxu0 %v1860_v6  ;;  %1756 = vset.pattern.permute.xlu1 %v1860_v6  ;;  %v680_v10 = vld [vmem:[%s1987_s22 + $0x8] sm:$0xff]  ;;  %v1662_v16 = vld [vmem:[%s2695_s3 + $0x10] sm:$0x3]  ;;  %vm720_vm3 = vcmask 1043456  }
  0x3a   : > { %s1858_s28 = smov 15   ;;  %s1859_s29 = smov 1   ;;  %1755 = vset.pattern.permute.xlu0 %v1860_v6  ;;  %v2043_v12 = vshrl.u32 %v456_v11, 7  ;;  %v2045_v13 = vand.u32 127, %v456_v11  ;;  %v1660_v19 = vld [vmem:[%s2695_s3 + $0xc] sm:$0x3] }
  0x3b   : > { %s1861_s14 = smov 17   ;;  %s1862_s17 = smov 16   ;;  %v1661_v21 = vld [vmem:[%s2695_s3 + $0xe] sm:$0x3]  ;;  %v1659_v30 = vld [vmem:[%s2695_s3 + $0xa] sm:$0x3] }
  0x3c   : > { %v2048_v14 = vsub.s32 0, %v2043_v12  ;;  %v2051_v15 = vsub.s32 1, %v2043_v12  ;;  %vm627_vm0 = vcmp.lt.s32.totalorder %v2045_v13, 111  ;;  %vm579_vm1 = vcmp.lt.s32.totalorder %v2045_v13, 113  ;;  %v1657_v57 = vld [vmem:[%s2695_s3 + $0x4] sm:$0x3] }
  0x3d   : > { %v2006_v5 = vld [vmem:[#allocation2 + $0x8] sm:$0xff]  ;;  %vm603_vm2 = vcmp.lt.s32.totalorder %v2045_v13, 112  ;;  %vm555_vm4 = vcmp.lt.s32.totalorder %v2045_v13, 127  ;;  %v1658_v58 = vld [vmem:[%s2695_s3 + $0x6] sm:$0x3]  ;;  %vm505_vm5 = vcmp.lt.s32.totalorder %v2045_v13, 15 }
  0x3e   : > { %v2000_v4 = vld [vmem:[#allocation2] sm:$0xff]  ;;  %v636_v20 = vrot.slane %v1662_v16, %v2048_v14  ;;  %v640_v22 = vrot.slane %v1662_v16, %v2051_v15  ;;  %v588_v23 = vrot.slane %v1660_v19, %v2048_v14  ;;  %v592_v26 = vrot.slane %v1660_v19, %v2051_v15  ;;  %p1685_p5 = scmp.ne.s32.totalorder %s1835_s30, 3 }
  0x3f   : > { %575 = vrot.lane.b32.xlu1 %v2000_v4, %s1854_s0  ;;  %623 = vrot.lane.b32.xlu0 %v2000_v4, %s1855_s15  ;;  %v612_v29 = vrot.slane %v1661_v21, %v2048_v14  ;;  %v616_v33 = vrot.slane %v1661_v21, %v2051_v15  ;;  %v564_v40 = vrot.slane %v1659_v30, %v2048_v14  ;;  %vm529_vm6 = vcmp.lt.s32.totalorder %v2045_v13, 1  ;;  %v1656_v19 = vld [vmem:[%s2695_s3 + $0x2] sm:$0x3] }
  0x40   : > { %v568_v44 = vrot.slane %v1659_v30, %v2051_v15  ;;  %v514_v63 = vrot.slane %v1657_v57, %v2048_v14  ;;  %v518_v0 = vrot.slane %v1657_v57, %v2051_v15  ;;  %v538_v1 = vrot.slane %v1658_v58, %v2048_v14 }
  0x41   : > { %v542_v2 = vrot.slane %v1658_v58, %v2051_v15  ;;  %vm458_vm7 = vcmp.lt.s32.totalorder %v2045_v13, 17  ;;  %vm481_vm8 = vcmp.lt.s32.totalorder %v2045_v13, 16  ;;  %vm713_vm9 = vcmask 588800  }
  0x42   : > { %vm1394_vm10 = vcmask 261120  }
  0x43   : > { %577 = vrot.lane.b32.xlu1 %v2006_v5, %s1854_s0  ;;  %625 = vrot.lane.b32.xlu0 %v2006_v5, %s1855_s15 }
  0x47   : > { %601 = vrot.lane.b32.xlu1 %v2006_v5, %s1856_s16  ;;  %599 = vrot.lane.b32.xlu0 %v2000_v4, %s1856_s16 }
  0x4b   : > { %553 = vrot.lane.b32.xlu1 %v2006_v5, %s1857_s24  ;;  %551 = vrot.lane.b32.xlu0 %v2000_v4, %s1857_s24 }
  0x4f   : > { %503 = vrot.lane.b32.xlu1 %v2006_v5, %s1858_s28  ;;  %501 = vrot.lane.b32.xlu0 %v2000_v4, %s1858_s28 }
  0x53   : > { %527 = vrot.lane.b32.xlu1 %v2006_v5, %s1859_s29  ;;  %525 = vrot.lane.b32.xlu0 %v2000_v4, %s1859_s29 }
  0x57   : > { %454 = vrot.lane.b32.xlu1 %v2006_v5, %s1861_s14  ;;  %452 = vrot.lane.b32.xlu0 %v2000_v4, %s1861_s14 }
  0x5b   : > { %479 = vrot.lane.b32.xlu1 %v2006_v5, %s1862_s17  ;;  %477 = vrot.lane.b32.xlu0 %v2000_v4, %s1862_s17 }
  0x5f   : > { %700 = vperm.xlu1 %1756, %v682_v7   ;;  %695 = vperm.xlu0 %1755, %v681_v8  }
  0x63   : > { %685 = vperm.xlu1 %1756, %v679_v9   ;;  %690 = vperm.xlu0 %1755, %v680_v10  }
  0xb1   : > { %v576_v17 = vpop.permute.xlu1 %575  ;;  %v624_v18 = vpop.permute.xlu0 %623 }
  0xb5   : > { %v578_v24 = vpop.permute.xlu1 %577  ;;  %v626_v25 = vpop.permute.xlu0 %625 }
  0xb6   : > { %v628_v27 = vsel %vm627_vm0, %v624_v18, %v626_v25  ;;  %v629_v28 = vsel %vm627_vm0, %v626_v25, %v624_v18  ;;  %v580_v31 = vsel %vm579_vm1, %v576_v17, %v578_v24  ;;  %v581_v35 = vsel %vm579_vm1, %v578_v24, %v576_v17  ;;  %v461_v18 = vld [vmem:[%s2695_s3] sm:$0x3] }
  0xb7   : > { %v643_v32 = vmul.f32 %v636_v20, %v628_v27  ;;  %v644_v34 = vmul.f32 %v640_v22, %v629_v28  ;;  %v595_v41 = vmul.f32 %v588_v23, %v580_v31  ;;  %v596_v45 = vmul.f32 %v592_v26, %v581_v35 }
  0xb8   : > { %v466_v24 = vrot.slane %v461_v18, %v2048_v14  ;;  %v470_v25 = vrot.slane %v461_v18, %v2051_v15  ;;  %v490_v26 = vrot.slane %v1656_v19, %v2048_v14  ;;  %v494_v27 = vrot.slane %v1656_v19, %v2051_v15 }
  0xb9   : > { %v602_v36 = vpop.permute.xlu1 %601  ;;  %v600_v37 = vpop.permute.xlu0 %599  ;;  %v678_v38 = vpack.c.bf16 %v644_v34, %v644_v34  ;;  %v677_v39 = vpack.c.bf16 %v643_v32, %v643_v32 }
  0xba   : > { %v604_v42 = vsel %vm603_vm2, %v600_v37, %v602_v36  ;;  %v605_v43 = vsel %vm603_vm2, %v602_v36, %v600_v37 }
  0xbb   : > { %v619_v46 = vmul.f32 %v612_v29, %v604_v42  ;;  %v620_v47 = vmul.f32 %v616_v33, %v605_v43  ;;  %1665 = vmatprep.subr.msk.bf16.mxu0 %vm720_vm3, %v678_v38  ;;  %v722_v48 = vsel %vm720_vm3, %v677_v39, 0 }
  0xbc   : > { %734 = vmatpush1.bf16.msra.mxu0 %v722_v48 }
  0xbd   : > { %v554_v49 = vpop.permute.xlu1 %553  ;;  %v552_v50 = vpop.permute.xlu0 %551  ;;  %v676_v51 = vpack.c.bf16 %v620_v47, %v596_v45  ;;  %v675_v52 = vpack.c.bf16 %v619_v46, %v595_v41  ;;  %v1758_v41 = vld [vmem:[%s2696_s4 + $0x8] sm:$0xff]  }
  0xbe   : > { %v556_v53 = vsel %vm555_vm4, %v552_v50, %v554_v49  ;;  %v557_v54 = vsel %vm555_vm4, %v554_v49, %v552_v50 }
  0xbf   : > { %v571_v55 = vmul.f32 %v564_v40, %v556_v53  ;;  %v572_v56 = vmul.f32 %v568_v44, %v557_v54  ;;  %735 = vmatprep.subr.bf16.mxu0 %v676_v51  ;;  %v1757_v40 = vld [vmem:[%s2696_s4] sm:$0xff]  }
  0xc0   : > { %736 = vmatpush1.bf16.msra.mxu0 %v675_v52 }
  0xc1   : > { %v504_v59 = vpop.permute.xlu1 %503  ;;  %v502_v60 = vpop.permute.xlu0 %501  ;;  %v674_v61 = vpack.c.bf16 %v572_v56, %v2006_v5  ;;  %v673_v62 = vpack.c.bf16 %v571_v55, %v2000_v4 }
  0xc2   : > { %v506_v3 = vsel %vm505_vm5, %v502_v60, %v504_v59  ;;  %v507_v7 = vsel %vm505_vm5, %v504_v59, %v502_v60 }
  0xc3   : > { %737 = vmatprep.subr.bf16.mxu0 %v674_v61  ;;  %v521_v10 = vmul.f32 %v514_v63, %v507_v7  ;;  %v522_v11 = vmul.f32 %v518_v0, %v506_v3 }
  0xc4   : > { %738 = vmatpush1.bf16.msra.mxu0 %v673_v62 }
  0xc5   : > { %v528_v5 = vpop.permute.xlu1 %527  ;;  %v526_v4 = vpop.permute.xlu0 %525 }
  0xc6   : > { %v530_v8 = vsel %vm529_vm6, %v526_v4, %v528_v5  ;;  %v531_v9 = vsel %vm529_vm6, %v528_v5, %v526_v4 }
  0xc7   : > { %v545_v16 = vmul.f32 %v538_v1, %v531_v9  ;;  %v546_v17 = vmul.f32 %v542_v2, %v530_v8 }
  0xc9   : > { %v455_v20 = vpop.permute.xlu1 %454  ;;  %v453_v21 = vpop.permute.xlu0 %452  ;;  %v672_v22 = vpack.c.bf16 %v546_v17, %v522_v11  ;;  %v671_v23 = vpack.c.bf16 %v545_v16, %v521_v10 }
  0xca   : > { %v459_v28 = vsel %vm458_vm7, %v453_v21, %v455_v20  ;;  %v460_v29 = vsel %vm458_vm7, %v455_v20, %v453_v21 }
  0xcb   : > { %739 = vmatprep.subr.bf16.mxu0 %v672_v22  ;;  %v473_v34 = vmul.f32 %v466_v24, %v460_v29  ;;  %v474_v35 = vmul.f32 %v470_v25, %v459_v28 }
  0xcc   : > { %740 = vmatpush1.bf16.msra.mxu0 %v671_v23 }
  0xcd   : > { %v480_v30 = vpop.permute.xlu1 %479  ;;  %v478_v31 = vpop.permute.xlu0 %477 }
  0xce   : > { %v482_v32 = vsel %vm481_vm8, %v478_v31, %v480_v30  ;;  %v483_v33 = vsel %vm481_vm8, %v480_v30, %v478_v31 }
  0xcf   : > { %v497_v36 = vmul.f32 %v490_v26, %v483_v33  ;;  %v498_v37 = vmul.f32 %v494_v27, %v482_v32 }
  0xd1   : > { %v670_v38 = vpack.c.bf16 %v498_v37, %v474_v35  ;;  %v669_v39 = vpack.c.bf16 %v497_v36, %v473_v34 }
  0xd3   : > { %741 = vmatprep.subr.bf16.mxu0 %v670_v38 }
  0xd4   : > { %742 = vmatpush1.bf16.msra.mxu0 %v669_v39 }
  0xd7   : > { %1666 = vmatmul.mubr.msk.bf16.vlgmr.msra.gmra.mxu0 %vm713_vm9, %v1757_v40 }
  0xd8   : > { %769 = vmatprep.mubr.bf16.mxu0 %v1860_v6 }
  0xda   : > { %v701_v42 = vpop.permute.xlu1 %700  ;;  %v696_v43 = vpop.permute.xlu0 %695 }
  0xde   : > { %v686_v44 = vpop.permute.xlu1 %685  ;;  %v691_v49 = vpop.permute.xlu0 %690 }
  0xdf   : > { %1667 = vmatmul.mubr.msk.bf16.gmra.mxu0 %vm713_vm9, %v1758_v41 }
  0xe0   : > { %1471 = vmatprep.mubr.bf16.mxu0 %v1860_v6 }
 0x197   : > { %v761_v45 = vpop.f32.mrf.mxu0 }
 0x198   : > { %v762_v46 = vadd.f32 %v761_v45, %v686_v44 }
 0x199   : > { %v763_v47 = vpop.f32.mrf.mxu0 }
 0x19a   : > { %v1668_v48 = vmul.f32 -1.442695, %v762_v46  ;;  %v764_v53 = vadd.f32 %v763_v47, %v686_v44  ;;  %v1260_v47 = vld [vmem:[%s2697_s5] sm:$0x3f] }
 0x19b   : > { %v765_v50 = vpop.f32.mrf.mxu0 }
 0x19c   : > { %1760 = vpow2.f32 %v1668_v48  ;;  %v766_v51 = vadd.f32 %v765_v50, %v691_v49  ;;  %v1669_v55 = vmul.f32 -1.442695, %v764_v53 }
 0x19d   : > { %v767_v54 = vpop.f32.mrf.mxu0 }
 0x19e   : > { %v1670_v52 = vmul.f32 -1.442695, %v766_v51  ;;  %v768_v56 = vadd.f32 %v767_v54, %v691_v49 }
 0x19f   : > { %v771_v61 = vpop.f32.mrf.mxu0 }
 0x1a0   : > { %1762 = vpow2.f32 %v1670_v52  ;;  %v1671_v6 = vmul.f32 -1.442695, %v768_v56  ;;  %v772_v63 = vadd.f32 %v771_v61, %v696_v43 }
 0x1a1   : > { %1764 = vpow2.f32 %v1669_v55  ;;  %v773_v62 = vpop.f32.mrf.mxu0  ;;  %v1369_v55 = vld [vmem:[%s2699_s7] sm:$0xf] }
 0x1a2   : > { %v1672_v3 = vmul.f32 -1.442695, %v772_v63  ;;  %v774_v17 = vadd.f32 %v773_v62, %v696_v43 }
 0x1a3   : > { %v775_v0 = vpop.f32.mrf.mxu0 }
 0x1a4   : > { %v776_v7 = vadd.f32 %v775_v0, %v701_v42  ;;  %v1673_v21 = vmul.f32 -1.442695, %v774_v17  ;;  %v1677_v0 = vld [vmem:[%s2695_s3 + $0x4] sm:$0x3] }
 0x1a5   : > { %v777_v19 = vpop.f32.mrf.mxu0 }
 0x1a6   : > { %v1674_v10 = vmul.f32 -1.442695, %v776_v7  ;;  %v778_v22 = vadd.f32 %v777_v19, %v701_v42  ;;  %v1863_v42 = vmov 1983009808  }
 0x1a7   : > { %v1378_v43 = vunpack.c.l.s4 %v1863_v42 }
 0x1a8   : > { %v1675_v27 = vmul.f32 -1.442695, %v778_v22 }
 0x1a9   : > { %v1761_v57 = vpop.eup %1760  ;;  %v1379_v44 = vunpack.c.0.s8 %v1378_v43 }
 0x1aa   : > { %v804_v58 = vadd.f32 1.0, %v1761_v57 }
 0x1ab   : > { %v1382_v45 = vsub.s32 %v1379_v44, %v2043_v12  ;;  %v1376_v12 = vcombine.high %v1260_v47, %v1260_v47 }
 0x1ac   : > { %1766 = vrcp.f32 %v804_v58 }
 0x1ad   : > { %v1763_v59 = vpop.eup %1762  ;;  %1768 = vpow2.f32 %v1671_v6  ;;  %v2279_v48 = vrot.slane %v1260_v47, %v1382_v45  ;;  %v2293_v52 = vrot.slane %v1376_v12, %v1382_v45 }
 0x1ae   : > { %v806_v60 = vadd.f32 1.0, %v1763_v59  ;;  %v1765_v1 = vpop.eup %1764  ;;  %v2307_v59 = vld [vmem:[%s2695_s3 + $0x6] sm:$0x3] }
 0x1af   : > { %v805_v4 = vadd.f32 1.0, %v1765_v1  ;;  %2719 = vst [vmem:[#allocation14_spill] sm:$0xff] %v2279_v48  ;;  %v1391_v49 = vcombine.high %v2279_v48, %v2279_v48  ;;  %2720 = vst [vmem:[#allocation15_spill] sm:$0xff] %v2293_v52  ;;  %v2315_v62 = vrot.slane %v2307_v59, %v2048_v14 }
 0x1b0   : > { %1770 = vrcp.f32 %v806_v60 }
 0x1b1   : > { %1772 = vpow2.f32 %v1672_v3  ;;  %1430 = vmatprep.mubr.bf16.mxu1 %v1391_v49 }
 0x1b2   : > { %1774 = vrcp.f32 %v805_v4  ;;  %v2334_v4 = vrot.slane %v1677_v0, %v2048_v14 }
 0x1b3   : > { %1776 = vpow2.f32 %v1674_v10  ;;  %v1676_v10 = vld [vmem:[%s2695_s3 + $0x2] sm:$0x3] }
 0x1b6   : > { %v2735_v13 = vld [vmem:[#allocation15_spill] sm:$0xff] }
 0x1b9   : > { %v1767_v2 = vpop.eup %1766 }
 0x1ba   : > { %v2143_v5 = vmul.f32 %v1767_v2, %v762_v46  ;;  %v1769_v8 = vpop.eup %1768 }
 0x1bb   : > { %v807_v16 = vadd.f32 1.0, %v1769_v8  ;;  %v2337_v8 = vrot.slane %v1677_v0, %v2051_v15 }
 0x1bc   : > { %2715 = vst [vmem:[#allocation10_spill] sm:$0xff] %v2143_v5  ;;  %992 = vrot.lane.b32.xlu1 %v2143_v5, %s1859_s29 }
 0x1bd   : > { %v1771_v9 = vpop.eup %1770  ;;  %1778 = vrcp.f32 %v807_v16 }
 0x1be   : > { %v2147_v11 = vmul.f32 %v1771_v9, %v766_v51  ;;  %v1773_v18 = vpop.eup %1772  ;;  %1780 = vpow2.f32 %v1673_v21  ;;  %v2352_v21 = vrot.slane %v1676_v10, %v2048_v14 }
 0x1bf   : > { %v1775_v20 = vpop.eup %1774  ;;  %v808_v25 = vadd.f32 1.0, %v1773_v18 }
 0x1c0   : > { %2716 = vst [vmem:[#allocation11_spill] sm:$0xff] %v2147_v11  ;;  %940 = vrot.lane.b32.xlu1 %v2143_v5, %s1858_s28  ;;  %994 = vrot.lane.b32.xlu0 %v2147_v11, %s1859_s29  ;;  %v1777_v23 = vpop.eup %1776  ;;  %v2165_v24 = vmul.f32 %v1775_v20, %v764_v53 }
 0x1c1   : > { %1782 = vrcp.f32 %v808_v25  ;;  %v810_v29 = vadd.f32 1.0, %v1777_v23 }
 0x1c2   : > { %2717 = vst [vmem:[#allocation12_spill] sm:$0xff] %v2165_v24  ;;  %1784 = vpow2.f32 %v1675_v27 }
 0x1c3   : > { %1786 = vrcp.f32 %v810_v29 }
 0x1c4   : > { %888 = vrot.lane.b32.xlu1 %v2143_v5, %s1862_s17  ;;  %942 = vrot.lane.b32.xlu0 %v2147_v11, %s1858_s28 }
 0x1c8   : > { %836 = vrot.lane.b32.xlu1 %v2143_v5, %s1861_s14  ;;  %890 = vrot.lane.b32.xlu0 %v2147_v11, %s1862_s17 }
 0x1ca   : > { %v1779_v26 = vpop.eup %1778 }
 0x1cb   : > { %v2171_v28 = vmul.f32 %v1779_v26, %v768_v56  ;;  %v1781_v30 = vpop.eup %1780 }
 0x1cc   : > { %1156 = vrot.lane.b32.xlu1 %v2143_v5, %s1856_s16  ;;  %838 = vrot.lane.b32.xlu0 %v2147_v11, %s1861_s14  ;;  %v809_v34 = vadd.f32 1.0, %v1781_v30 }
 0x1cd   : > { %2718 = vst [vmem:[#allocation13_spill] sm:$0xff] %v2171_v28 }
 0x1ce   : > { %v1783_v31 = vpop.eup %1782  ;;  %1788 = vrcp.f32 %v809_v34 }
 0x1cf   : > { %v1785_v32 = vpop.eup %1784  ;;  %v2189_v33 = vmul.f32 %v1783_v31, %v772_v63  ;;  %v860_v31 = vld [vmem:[%s2695_s3] sm:$0x3] }
 0x1d0   : > { %1000 = vrot.lane.b32.xlu1 %v2165_v24, %s1859_s29  ;;  %1158 = vrot.lane.b32.xlu0 %v2147_v11, %s1856_s16  ;;  %v1787_v35 = vpop.eup %1786  ;;  %v811_v37 = vadd.f32 1.0, %v1785_v32  ;;  %v2385_v42 = vrot.slane %v860_v31, %v2048_v14  ;;  %v2388_v43 = vrot.slane %v860_v31, %v2051_v15 }
 0x1d1   : > { %v2195_v36 = vmul.f32 %v1787_v35, %v776_v7 }
 0x1d2   : > { %1790 = vrcp.f32 %v811_v37 }
 0x1d4   : > { %948 = vrot.lane.b32.xlu1 %v2165_v24, %s1858_s28  ;;  %1002 = vrot.lane.b32.xlu0 %v2171_v28, %s1859_s29 }
 0x1d8   : > { %896 = vrot.lane.b32.xlu1 %v2165_v24, %s1862_s17  ;;  %950 = vrot.lane.b32.xlu0 %v2171_v28, %s1858_s28 }
 0x1db   : > { %v1789_v38 = vpop.eup %1788 }
 0x1dc   : > { %844 = vrot.lane.b32.xlu1 %v2165_v24, %s1861_s14  ;;  %898 = vrot.lane.b32.xlu0 %v2171_v28, %s1862_s17  ;;  %v2213_v39 = vmul.f32 %v1789_v38, %v774_v17 }
 0x1df   : > { %v1791_v40 = vpop.eup %1790 }
 0x1e0   : > { %1164 = vrot.lane.b32.xlu1 %v2165_v24, %s1856_s16  ;;  %846 = vrot.lane.b32.xlu0 %v2171_v28, %s1861_s14  ;;  %v2219_v41 = vmul.f32 %v1791_v40, %v778_v22  ;;  %v2355_v22 = vrot.slane %v1676_v10, %v2051_v15 }
 0x1e4   : > { %996 = vrot.lane.b32.xlu1 %v2189_v33, %s1859_s29  ;;  %1166 = vrot.lane.b32.xlu0 %v2171_v28, %s1856_s16 }
 0x1e8   : > { %944 = vrot.lane.b32.xlu1 %v2189_v33, %s1858_s28  ;;  %998 = vrot.lane.b32.xlu0 %v2195_v36, %s1859_s29 }
 0x1ec   : > { %892 = vrot.lane.b32.xlu1 %v2189_v33, %s1862_s17  ;;  %946 = vrot.lane.b32.xlu0 %v2195_v36, %s1858_s28 }
 0x1f0   : > { %840 = vrot.lane.b32.xlu1 %v2189_v33, %s1861_s14  ;;  %894 = vrot.lane.b32.xlu0 %v2195_v36, %s1862_s17 }
 0x1f4   : > { %1160 = vrot.lane.b32.xlu1 %v2189_v33, %s1856_s16  ;;  %842 = vrot.lane.b32.xlu0 %v2195_v36, %s1861_s14 }
 0x1f8   : > { %1004 = vrot.lane.b32.xlu1 %v2213_v39, %s1859_s29  ;;  %1162 = vrot.lane.b32.xlu0 %v2195_v36, %s1856_s16 }
 0x1fc   : > { %1108 = vrot.lane.b32.xlu1 %v2189_v33, %s1854_s0  ;;  %1006 = vrot.lane.b32.xlu0 %v2219_v41, %s1859_s29  ;;  %s1684_s29 = sshll.u32 %s1835_s30, 7 }
 0x1fd   : > { %s1481_s10 = sld [smem:[#allocation5 + %s1684_s29]] }
 0x200   : > { %952 = vrot.lane.b32.xlu1 %v2213_v39, %s1858_s28  ;;  %1110 = vrot.lane.b32.xlu0 %v2195_v36, %s1854_s0 }
 0x204   : > { %900 = vrot.lane.b32.xlu1 %v2213_v39, %s1862_s17  ;;  %954 = vrot.lane.b32.xlu0 %v2219_v41, %s1858_s28 }
 0x208   : > { %848 = vrot.lane.b32.xlu1 %v2213_v39, %s1861_s14  ;;  %1106 = vrot.lane.b32.xlu0 %v2147_v11, %s1854_s0 }
 0x20c   : > { %1168 = vrot.lane.b32.xlu1 %v2213_v39, %s1856_s16  ;;  %902 = vrot.lane.b32.xlu0 %v2219_v41, %s1862_s17 }
 0x210   : > { %1116 = vrot.lane.b32.xlu1 %v2213_v39, %s1854_s0  ;;  %1114 = vrot.lane.b32.xlu0 %v2171_v28, %s1854_s0 }
 0x214   : > { %1104 = vrot.lane.b32.xlu1 %v2143_v5, %s1854_s0  ;;  %850 = vrot.lane.b32.xlu0 %v2219_v41, %s1861_s14  ;;  %s1482_s14 = sadd.s32 1, %s1684_s29 }
 0x215   : > { %s1483_s17 = sld [smem:[#allocation5 + %s1482_s14]] }
 0x218   : > { %1112 = vrot.lane.b32.xlu1 %v2165_v24, %s1854_s0  ;;  %1058 = vrot.lane.b32.xlu0 %v2195_v36, %s1857_s24 }
 0x21c   : > { %1056 = vrot.lane.b32.xlu1 %v2189_v33, %s1857_s24  ;;  %1170 = vrot.lane.b32.xlu0 %v2219_v41, %s1856_s16 }
 0x220   : > { %1064 = vrot.lane.b32.xlu1 %v2213_v39, %s1857_s24  ;;  %1054 = vrot.lane.b32.xlu0 %v2147_v11, %s1857_s24 }
 0x224   : > { %1052 = vrot.lane.b32.xlu1 %v2143_v5, %s1857_s24  ;;  %1118 = vrot.lane.b32.xlu0 %v2219_v41, %s1854_s0 }
 0x228   : > { %1060 = vrot.lane.b32.xlu1 %v2165_v24, %s1857_s24  ;;  %1062 = vrot.lane.b32.xlu0 %v2171_v28, %s1857_s24 }
 0x22c   : > { %1212 = vrot.lane.b32.xlu1 %v2189_v33, %s1855_s15  ;;  %1066 = vrot.lane.b32.xlu0 %v2219_v41, %s1857_s24 }
 0x22e   : > { %v2274_v46 = vpop.permute.xlu1 %992 }
 0x230   : > { %1220 = vrot.lane.b32.xlu1 %v2213_v39, %s1855_s15  ;;  %1214 = vrot.lane.b32.xlu0 %v2195_v36, %s1855_s15 }
 0x232   : > { %v941_v50 = vpop.permute.xlu1 %940  ;;  %v2287_v51 = vpop.permute.xlu0 %994 }
 0x234   : > { %1208 = vrot.lane.b32.xlu1 %v2143_v5, %s1855_s15  ;;  %1210 = vrot.lane.b32.xlu0 %v2147_v11, %s1855_s15 }
 0x236   : > { %v889_v53 = vpop.permute.xlu1 %888  ;;  %v943_v54 = vpop.permute.xlu0 %942 }
 0x238   : > { %1216 = vrot.lane.b32.xlu1 %v2165_v24, %s1855_s15  ;;  %1222 = vrot.lane.b32.xlu0 %v2219_v41, %s1855_s15 }
 0x23a   : > { %v837_v56 = vpop.permute.xlu1 %836  ;;  %v891_v57 = vpop.permute.xlu0 %890 }
 0x23c   : > { %1372 = vperm.xlu1 %1756, %v1369_v55   ;;  %1218 = vrot.lane.b32.xlu0 %v2171_v28, %s1855_s15  ;;  %s1484_s15 = sadd.s32 2, %s1684_s29 }
 0x23d   : > { %s1485_s22 = sld [smem:[#allocation5 + %s1484_s15]] }
 0x23e   : > { %v1157_v58 = vpop.permute.xlu1 %1156  ;;  %v839_v6 = vpop.permute.xlu0 %838 }
 0x242   : > { %v2309_v60 = vpop.permute.xlu1 %1000  ;;  %v2311_v61 = vpop.permute.xlu0 %1158 }
 0x243   : > { %v1012_v63 = vsel %vm529_vm6, %v2309_v60, %v2274_v46  ;;  %v1008_v38 = vsel %vm529_vm6, %v2274_v46, %v2309_v60 }
 0x244   : > { %v2331_v7 = vmul.f32 %v2315_v62, %v1012_v63 }
 0x246   : > { %v949_v1 = vpop.permute.xlu1 %948  ;;  %v2324_v2 = vpop.permute.xlu0 %1002 }
 0x247   : > { %v1013_v3 = vsel %vm529_vm6, %v2324_v2, %v2287_v51  ;;  %v956_v16 = vsel %vm505_vm5, %v941_v50, %v949_v1  ;;  %v960_v17 = vsel %vm505_vm5, %v949_v1, %v941_v50 }
 0x248   : > { %v2340_v9 = vmul.f32 %v2315_v62, %v1013_v3  ;;  %v2362_v26 = vmul.f32 %v2334_v4, %v960_v17  ;;  %v2365_v27 = vmul.f32 %v2337_v8, %v956_v16 }
 0x24a   : > { %v897_v18 = vpop.permute.xlu1 %896  ;;  %v951_v19 = vpop.permute.xlu0 %950 }
 0x24b   : > { %v957_v23 = vsel %vm505_vm5, %v943_v54, %v951_v19  ;;  %v961_v25 = vsel %vm505_vm5, %v951_v19, %v943_v54  ;;  %v904_v32 = vsel %vm481_vm8, %v889_v53, %v897_v18  ;;  %v908_v34 = vsel %vm481_vm8, %v897_v18, %v889_v53  ;;  %v1681_v53 = vld [vmem:[%s2695_s3 + $0xe] sm:$0x3] }
 0x24c   : > { %v2368_v29 = vmul.f32 %v2334_v4, %v961_v25  ;;  %v2371_v30 = vmul.f32 %v2337_v8, %v957_v23  ;;  %v2395_v47 = vmul.f32 %v2352_v21, %v908_v34  ;;  %v2398_v49 = vmul.f32 %v2355_v22, %v904_v32 }
 0x24d   : > { %v2418_v3 = vrot.slane %v1681_v53, %v2048_v14  ;;  %v2421_v10 = vrot.slane %v1681_v53, %v2051_v15 }
 0x24e   : > { %v845_v35 = vpop.permute.xlu1 %844  ;;  %v899_v37 = vpop.permute.xlu0 %898 }
 0x24f   : > { %v905_v44 = vsel %vm481_vm8, %v891_v57, %v899_v37  ;;  %v909_v45 = vsel %vm481_vm8, %v899_v37, %v891_v57  ;;  %v852_v54 = vsel %vm458_vm7, %v837_v56, %v845_v35  ;;  %v856_v55 = vsel %vm458_vm7, %v845_v35, %v837_v56 }
 0x250   : > { %v2401_v50 = vmul.f32 %v2352_v21, %v909_v45  ;;  %v2404_v12 = vmul.f32 %v2355_v22, %v905_v44  ;;  %v2428_v17 = vmul.f32 %v2385_v42, %v856_v55  ;;  %v2431_v18 = vmul.f32 %v2388_v43, %v852_v54 }
 0x252   : > { %v1165_v57 = vpop.permute.xlu1 %1164  ;;  %v847_v63 = vpop.permute.xlu0 %846 }
 0x253   : > { %v853_v16 = vsel %vm458_vm7, %v839_v6, %v847_v63  ;;  %v857_v56 = vsel %vm458_vm7, %v847_v63, %v839_v6  ;;  %v1172_v25 = vsel %vm603_vm2, %v1157_v58, %v1165_v57  ;;  %v1176_v31 = vsel %vm603_vm2, %v1165_v57, %v1157_v58 }
 0x254   : > { %v2434_v19 = vmul.f32 %v2385_v42, %v857_v56  ;;  %v2437_v23 = vmul.f32 %v2388_v43, %v853_v16  ;;  %v2454_v45 = vmul.f32 %v2418_v3, %v1172_v25  ;;  %v2457_v58 = vmul.f32 %v2421_v10, %v1176_v31 }
 0x255   : > { %v1009_v63 = vsel %vm529_vm6, %v2287_v51, %v2324_v2 }
 0x256   : > { %v997_v32 = vpop.permute.xlu1 %996  ;;  %v1167_v6 = vpop.permute.xlu0 %1166 }
 0x257   : > { %v1173_v37 = vsel %vm603_vm2, %v2311_v61, %v1167_v6  ;;  %v1177_v44 = vsel %vm603_vm2, %v1167_v6, %v2311_v61  ;;  %v1025_v61 = vrot.slane %v2307_v59, %v2051_v15 }
 0x258   : > { %v2460_v53 = vmul.f32 %v2418_v3, %v1173_v37  ;;  %v2463_v54 = vmul.f32 %v2421_v10, %v1177_v44 }
 0x259   : > { %v1031_v20 = vmul.f32 %v1025_v61, %v1009_v63  ;;  %v1029_v48 = vmul.f32 %v1025_v61, %v1008_v38 }
 0x25a   : > { %v945_v55 = vpop.permute.xlu1 %944  ;;  %v999_v57 = vpop.permute.xlu0 %998 }
 0x25b   : > { %v1346_v46 = vpack.c.bf16 %v1031_v20, %v1029_v48 }
 0x25e   : > { %v893_v16 = vpop.permute.xlu1 %892  ;;  %v947_v56 = vpop.permute.xlu0 %946 }
 0x262   : > { %v2469_v25 = vpop.permute.xlu1 %840  ;;  %v895_v31 = vpop.permute.xlu0 %894 }
 0x266   : > { %v2471_v6 = vpop.permute.xlu1 %1160  ;;  %v2473_v37 = vpop.permute.xlu0 %842 }
 0x26a   : > { %v1005_v35 = vpop.permute.xlu1 %1004  ;;  %v2475_v44 = vpop.permute.xlu0 %1162 }
 0x26b   : > { %v1010_v34 = vsel %vm529_vm6, %v997_v32, %v1005_v35  ;;  %v1014_v1 = vsel %vm529_vm6, %v1005_v35, %v997_v32 }
 0x26c   : > { %v1032_v2 = vmul.f32 %v2315_v62, %v1014_v1  ;;  %v1033_v32 = vmul.f32 %v1025_v61, %v1010_v34 }
 0x26e   : > { %v2487_v0 = vpop.permute.xlu1 %1108  ;;  %v1007_v40 = vpop.permute.xlu0 %1006 }
 0x26f   : > { %v1011_v51 = vsel %vm529_vm6, %v999_v57, %v1007_v40  ;;  %v1015_v59 = vsel %vm529_vm6, %v1007_v40, %v999_v57 }
 0x270   : > { %v1034_v52 = vmul.f32 %v2315_v62, %v1015_v59  ;;  %v1035_v35 = vmul.f32 %v1025_v61, %v1011_v51 }
 0x272   : > { %v953_v11 = vpop.permute.xlu1 %952  ;;  %v2499_v5 = vpop.permute.xlu0 %1110  ;;  %v1348_v28 = vpack.c.bf16 %v1035_v35, %v1033_v32  ;;  %v1347_v24 = vpack.c.bf16 %v1034_v52, %v1032_v2  ;;  %v2723_v35 = vpack.c.bf16 %v2368_v29, %v2362_v26 }
 0x273   : > { %v958_v60 = vsel %vm505_vm5, %v945_v55, %v953_v11  ;;  %v962_v40 = vsel %vm505_vm5, %v953_v11, %v945_v55  ;;  %v2721_v11 = vpack.c.bf16 %v2340_v9, %v2331_v7 }
 0x274   : > { %1398 = vmatprep.subr.bf16.mxu1 %v1348_v28  ;;  %v980_v52 = vmul.f32 %v2334_v4, %v962_v40  ;;  %v981_v28 = vmul.f32 %v2337_v8, %v958_v60 }
 0x275   : > { %1399 = vmatpush1.bf16.msra.mxu1 %v1347_v24 }
 0x276   : > { %v901_v1 = vpop.permute.xlu1 %900  ;;  %1400 = vmatprep.subr.bf16.mxu1 %v1346_v46  ;;  %v955_v62 = vpop.permute.xlu0 %954 }
 0x277   : > { %v959_v38 = vsel %vm505_vm5, %v947_v56, %v955_v62  ;;  %v963_v34 = vsel %vm505_vm5, %v955_v62, %v947_v56  ;;  %v906_v61 = vsel %vm481_vm8, %v893_v16, %v901_v1  ;;  %v910_v56 = vsel %vm481_vm8, %v901_v1, %v893_v16 }
 0x278   : > { %v982_v48 = vmul.f32 %v2334_v4, %v963_v34  ;;  %v983_v20 = vmul.f32 %v2337_v8, %v959_v38  ;;  %v2722_v8 = vpack.c.bf16 %v2371_v30, %v2365_v27  ;;  %v928_v59 = vmul.f32 %v2352_v21, %v910_v56 }
 0x279   : > { %1401 = vmatpush1.bf16.msra.mxu1 %v2721_v11  ;;  %v929_v2 = vmul.f32 %v2355_v22, %v906_v61 }
 0x27a   : > { %v849_v24 = vpop.permute.xlu1 %848  ;;  %v2516_v55 = vpop.permute.xlu0 %1106  ;;  %v1344_v57 = vpack.c.bf16 %v983_v20, %v981_v28  ;;  %v1343_v63 = vpack.c.bf16 %v982_v48, %v980_v52 }
 0x27b   : > { %v858_v40 = vsel %vm458_vm7, %v849_v24, %v2469_v25 }
 0x27c   : > { %1402 = vmatprep.subr.bf16.mxu1 %v1344_v57  ;;  %v876_v62 = vmul.f32 %v2385_v42, %v858_v40 }
 0x27d   : > { %1403 = vmatpush1.bf16.msra.mxu1 %v1343_v63  ;;  %v2727_v63 = vpack.c.bf16 %v2434_v19, %v2428_v17  ;;  %v1679_v19 = vld [vmem:[%s2695_s3 + $0xa] sm:$0x3] }
 0x27e   : > { %v1169_v4 = vpop.permute.xlu1 %1168  ;;  %1404 = vmatprep.subr.bf16.mxu1 %v2722_v8  ;;  %v903_v7 = vpop.permute.xlu0 %902  ;;  %v1085_v40 = vrot.slane %v1679_v19, %v2051_v15 }
 0x27f   : > { %v907_v9 = vsel %vm481_vm8, %v895_v31, %v903_v7  ;;  %v911_v51 = vsel %vm481_vm8, %v903_v7, %v895_v31  ;;  %v854_v31 = vsel %vm458_vm7, %v2469_v25, %v849_v24 }
 0x280   : > { %v930_v32 = vmul.f32 %v2352_v21, %v911_v51  ;;  %v931_v16 = vmul.f32 %v2355_v22, %v907_v9  ;;  %v2724_v22 = vpack.c.bf16 %v2404_v12, %v2398_v49  ;;  %v877_v38 = vmul.f32 %v2388_v43, %v854_v31 }
 0x281   : > { %1405 = vmatpush1.bf16.msra.mxu1 %v2723_v35  ;;  %v2725_v49 = vpack.c.bf16 %v2401_v50, %v2395_v47  ;;  %v2726_v47 = vpack.c.bf16 %v2437_v23, %v2431_v18 }
 0x282   : > { %v1117_v27 = vpop.permute.xlu1 %1116  ;;  %v1115_v30 = vpop.permute.xlu0 %1114  ;;  %v1340_v46 = vpack.c.bf16 %v931_v16, %v929_v2  ;;  %v1339_v60 = vpack.c.bf16 %v930_v32, %v928_v59  ;;  %v2728_v59 = vpack.c.bf16 %v2463_v54, %v2457_v58  ;;  %v1081_v54 = vrot.slane %v1679_v19, %v2048_v14 }
 0x283   : > { %v1122_v9 = vsel %vm579_vm1, %v2487_v0, %v1117_v27  ;;  %v1125_v17 = vsel %vm579_vm1, %v1115_v30, %v2516_v55  ;;  %v1121_v58 = vsel %vm579_vm1, %v2516_v55, %v1115_v30 }
 0x284   : > { %1406 = vmatprep.subr.bf16.mxu1 %v1340_v46 }
 0x285   : > { %1407 = vmatpush1.bf16.msra.mxu1 %v1339_v60 }
 0x286   : > { %v1105_v21 = vpop.permute.xlu1 %1104  ;;  %1408 = vmatprep.subr.bf16.mxu1 %v2724_v22  ;;  %v851_v26 = vpop.permute.xlu0 %850 }
 0x287   : > { %v855_v29 = vsel %vm458_vm7, %v2473_v37, %v851_v26  ;;  %v859_v1 = vsel %vm458_vm7, %v851_v26, %v2473_v37  ;;  %v1174_v37 = vsel %vm603_vm2, %v2471_v6, %v1169_v4 }
 0x288   : > { %v878_v25 = vmul.f32 %v2385_v42, %v859_v1  ;;  %v879_v34 = vmul.f32 %v2388_v43, %v855_v29  ;;  %v1178_v42 = vsel %vm603_vm2, %v1169_v4, %v2471_v6  ;;  %v1196_v24 = vmul.f32 %v2418_v3, %v1174_v37  ;;  %v1680_v6 = vld [vmem:[%s2695_s3 + $0xc] sm:$0x3] }
 0x289   : > { %1409 = vmatpush1.bf16.msra.mxu1 %v2725_v49  ;;  %v1197_v57 = vmul.f32 %v2421_v10, %v1178_v42  ;;  %v1133_v8 = vrot.slane %v1680_v6, %v2048_v14  ;;  %v1137_v7 = vrot.slane %v1680_v6, %v2051_v15 }
 0x28a   : > { %v1113_v12 = vpop.permute.xlu1 %1112  ;;  %v2558_v52 = vpop.permute.xlu0 %1058  ;;  %v1336_v28 = vpack.c.bf16 %v879_v34, %v877_v38  ;;  %v1335_v48 = vpack.c.bf16 %v878_v25, %v876_v62 }
 0x28b   : > { %v1144_v32 = vmul.f32 %v1133_v8, %v1122_v9  ;;  %v1143_v22 = vmul.f32 %v1137_v7, %v1125_v17  ;;  %v1142_v30 = vmul.f32 %v1133_v8, %v1121_v58 }
 0x28c   : > { %1410 = vmatprep.subr.bf16.mxu1 %v1336_v28 }
 0x28d   : > { %1411 = vmatpush1.bf16.msra.mxu1 %v1335_v48 }
 0x28e   : > { %v1057_v43 = vpop.permute.xlu1 %1056  ;;  %1412 = vmatprep.subr.bf16.mxu1 %v2726_v47  ;;  %v1171_v50 = vpop.permute.xlu0 %1170 }
 0x28f   : > { %v1175_v20 = vsel %vm603_vm2, %v2475_v44, %v1171_v50  ;;  %v1179_v11 = vsel %vm603_vm2, %v1171_v50, %v2475_v44 }
 0x290   : > { %v1198_v18 = vmul.f32 %v2418_v3, %v1175_v20  ;;  %v1199_v23 = vmul.f32 %v2421_v10, %v1179_v11  ;;  %v1126_v3 = vsel %vm579_vm1, %v1117_v27, %v2487_v0  ;;  %v1124_v10 = vsel %vm579_vm1, %v1113_v12, %v1105_v21 }
 0x291   : > { %1413 = vmatpush1.bf16.msra.mxu1 %v2727_v63  ;;  %v1120_v0 = vsel %vm579_vm1, %v1105_v21, %v1113_v12  ;;  %v1145_v27 = vmul.f32 %v1137_v7, %v1126_v3  ;;  %v1141_v46 = vmul.f32 %v1137_v7, %v1124_v10  ;;  %v2729_v21 = vpack.c.bf16 %v2460_v53, %v2454_v45 }
 0x292   : > { %v1065_v61 = vpop.permute.xlu1 %1064  ;;  %v1055_v56 = vpop.permute.xlu0 %1054  ;;  %v1364_v4 = vpack.c.bf16 %v1199_v23, %v1197_v57  ;;  %v1363_v44 = vpack.c.bf16 %v1198_v18, %v1196_v24  ;;  %v1140_v26 = vmul.f32 %v1133_v8, %v1120_v0  ;;  %v1352_v3 = vpack.c.bf16 %v2219_v41, %v2213_v39  ;;  %v2730_v39 = vld [vmem:[#allocation12_spill] sm:$0xff]  ;;  %v2731_v41 = vld [vmem:[#allocation13_spill] sm:$0xff] }
 0x293   : > { %v1070_v38 = vsel %vm555_vm4, %v1057_v43, %v1065_v61  ;;  %v1074_v55 = vsel %vm555_vm4, %v1065_v61, %v1057_v43  ;;  %v1358_v25 = vpack.c.bf16 %v1143_v22, %v1141_v46 }
 0x294   : > { %1414 = vmatprep.subr.bf16.mxu1 %v1364_v4  ;;  %v1092_v53 = vmul.f32 %v1081_v54, %v1070_v38  ;;  %v1093_v49 = vmul.f32 %v1085_v40, %v1074_v55  ;;  %v1357_v48 = vpack.c.bf16 %v1142_v30, %v1140_v26  ;;  %v1682_v4 = vld [vmem:[%s2695_s3 + $0x10] sm:$0x3] }
 0x295   : > { %1415 = vmatpush2.bf16.msra.mxu1 %v1363_v44  ;;  %v1241_v9 = vrot.slane %v1682_v4, %v2051_v15  ;;  %v1351_v15 = vpack.c.bf16 %v2195_v36, %v2189_v33  ;;  %v2734_v38 = vld [vmem:[#allocation14_spill] sm:$0xff] }
 0x296   : > { %v1053_v51 = vpop.permute.xlu1 %1052  ;;  %1416 = vmatprep.subr.bf16.mxu1 %v2728_v59  ;;  %v1119_v2 = vpop.permute.xlu0 %1118 }
 0x297   : > { %v1123_v16 = vsel %vm579_vm1, %v2499_v5, %v1119_v2  ;;  %v1127_v35 = vsel %vm579_vm1, %v1119_v2, %v2499_v5  ;;  %v1350_v2 = vpack.c.bf16 %v2731_v41, %v2730_v39 }
 0x298   : > { %v1146_v60 = vmul.f32 %v1133_v8, %v1123_v16  ;;  %v1147_v31 = vmul.f32 %v1137_v7, %v1127_v35  ;;  %v1237_v7 = vrot.slane %v1682_v4, %v2048_v14 }
 0x299   : > { %1417 = vmatpush2.bf16.msra.mxu1 %v2729_v21 }
 0x29a   : > { %v1061_v29 = vpop.permute.xlu1 %1060  ;;  %v1063_v5 = vpop.permute.xlu0 %1062  ;;  %v1360_v1 = vpack.c.bf16 %v1147_v31, %v1145_v27  ;;  %v1359_v62 = vpack.c.bf16 %v1146_v60, %v1144_v32 }
 0x29b   : > { %v1072_v34 = vsel %vm555_vm4, %v1061_v29, %v1053_v51  ;;  %v1073_v45 = vsel %vm555_vm4, %v1063_v5, %v1055_v56  ;;  %v1068_v37 = vsel %vm555_vm4, %v1053_v51, %v1061_v29  ;;  %v1069_v42 = vsel %vm555_vm4, %v1055_v56, %v1063_v5 }
 0x29c   : > { %1418 = vmatprep.subr.bf16.mxu1 %v1360_v1  ;;  %v1089_v50 = vmul.f32 %v1085_v40, %v1072_v34  ;;  %v1091_v20 = vmul.f32 %v1085_v40, %v1073_v45  ;;  %v1088_v63 = vmul.f32 %v1081_v54, %v1068_v37  ;;  %v1090_v61 = vmul.f32 %v1081_v54, %v1069_v42 }
 0x29d   : > { %1419 = vmatpush2.bf16.msra.mxu1 %v1359_v62 }
 0x29e   : > { %v1213_v12 = vpop.permute.xlu1 %1212  ;;  %1420 = vmatprep.subr.bf16.mxu1 %v1358_v25  ;;  %v1067_v28 = vpop.permute.xlu0 %1066  ;;  %v1354_v56 = vpack.c.bf16 %v1091_v20, %v1089_v50  ;;  %v1353_v8 = vpack.c.bf16 %v1090_v61, %v1088_v63  ;;  %v1793_v61 = vld [vmem:[#allocation2 + $0x8] sm:$0xff] }
 0x29f   : > { %v1071_v43 = vsel %vm555_vm4, %v2558_v52, %v1067_v28  ;;  %v1075_v47 = vsel %vm555_vm4, %v1067_v28, %v2558_v52 }
 0x2a0   : > { %v1094_v11 = vmul.f32 %v1081_v54, %v1071_v43  ;;  %v1095_v24 = vmul.f32 %v1085_v40, %v1075_v47  ;;  %v2732_v54 = vld [vmem:[#allocation10_spill] sm:$0xff]  ;;  %v2733_v40 = vld [vmem:[#allocation11_spill] sm:$0xff] }
 0x2a1   : > { %1421 = vmatpush2.bf16.msra.mxu1 %v1357_v48  ;;  %v1349_v21 = vpack.c.bf16 %v2733_v40, %v2732_v54 }
 0x2a2   : > { %v1221_v57 = vpop.permute.xlu1 %1220  ;;  %v1215_v6 = vpop.permute.xlu0 %1214  ;;  %v1356_v18 = vpack.c.bf16 %v1095_v24, %v1093_v49  ;;  %v1355_v23 = vpack.c.bf16 %v1094_v11, %v1092_v53  ;;  %v1486_v53 = vstv %s1483_s17  ;;  %v1494_v49 = vld [vmem:[%s1997_s1] sm:$0xff]  ;;  %v1491_v11 = vstv %s1481_s10 }
 0x2a3   : > { %v1226_v10 = vsel %vm627_vm0, %v1213_v12, %v1221_v57  ;;  %v1230_v17 = vsel %vm627_vm0, %v1221_v57, %v1213_v12  ;;  %v1495_v12 = vstv %s1485_s22  ;;  %v1792_v57 = vld [vmem:[#allocation2] sm:$0xff] }
 0x2a4   : > { %1422 = vmatprep.subr.bf16.mxu1 %v1356_v18  ;;  %v1248_v32 = vmul.f32 %v1237_v7, %v1226_v10  ;;  %v1249_v0 = vmul.f32 %v1241_v9, %v1230_v17  ;;  %v1496_v50 = vmul.f32 %v1495_v12, %v1494_v49 }
 0x2a5   : > { %1423 = vmatpush2.bf16.msra.mxu1 %v1355_v23 }
 0x2a6   : > { %v1209_v44 = vpop.permute.xlu1 %1208  ;;  %1424 = vmatprep.subr.bf16.mxu1 %v1354_v56  ;;  %v1211_v52 = vpop.permute.xlu0 %1210  ;;  %v1498_v4 = vcombine.high %v1496_v50, %v1496_v50 }
 0x2a9   : > { %1425 = vmatpush2.bf16.msra.mxu1 %v1353_v8 }
 0x2aa   : > { %v1217_v19 = vpop.permute.xlu1 %1216  ;;  %1426 = vmatprep.subr.bf16.mxu1 %v1352_v3  ;;  %v1223_v51 = vpop.permute.xlu0 %1222 }
 0x2ab   : > { %v1227_v59 = vsel %vm627_vm0, %v1215_v6, %v1223_v51  ;;  %v1231_v14 = vsel %vm627_vm0, %v1223_v51, %v1215_v6  ;;  %v1224_v27 = vsel %vm627_vm0, %v1209_v44, %v1217_v19  ;;  %v1228_v46 = vsel %vm627_vm0, %v1217_v19, %v1209_v44 }
 0x2ac   : > { %v1250_v16 = vmul.f32 %v1237_v7, %v1227_v59  ;;  %v1251_v35 = vmul.f32 %v1241_v9, %v1231_v14  ;;  %v1244_v22 = vmul.f32 %v1237_v7, %v1224_v27  ;;  %v1245_v26 = vmul.f32 %v1241_v9, %v1228_v46 }
 0x2ad   : > { %1427 = vmatpush2.bf16.msra.mxu1 %v1351_v15 }
 0x2ae   : > { %v1367_v60 = vpack.c.bf16 %v1250_v16, %v1248_v32  ;;  %1428 = vmatprep.subr.bf16.mxu1 %v1350_v2  ;;  %v1219_v31 = vpop.permute.xlu0 %1218  ;;  %v1368_v58 = vpack.c.bf16 %v1251_v35, %v1249_v0 }
 0x2af   : > { %v1225_v33 = vsel %vm627_vm0, %v1211_v52, %v1219_v31  ;;  %v1229_v36 = vsel %vm627_vm0, %v1219_v31, %v1211_v52 }
 0x2b0   : > { %v1246_v29 = vmul.f32 %v1237_v7, %v1225_v33  ;;  %v1247_v5 = vmul.f32 %v1241_v9, %v1229_v36  ;;  %1451 = vmatprep.subr.bf16.mxu0 %v1368_v58 }
 0x2b1   : > { %1429 = vmatpush2.bf16.msra.mxu1 %v1349_v21  ;;  %1452 = vmatpush1.bf16.msra.mxu0 %v1367_v60 }
 0x2b2   : > { %v1365_v1 = vpack.c.bf16 %v1246_v29, %v1244_v22  ;;  %v1366_v62 = vpack.c.bf16 %v1247_v5, %v1245_v26 }
 0x2b4   : > { %1431 = vmatmul.mubr.bf16.vlgmr.msra.gmra.mxu1 %v2734_v38  ;;  %1453 = vmatprep.subr.bf16.mxu0 %v1366_v62 }
 0x2b5   : > { %1454 = vmatpush1.bf16.msra.mxu0 %v1365_v1 }
 0x2b7   : > { %v1373_v30 = vpop.permute.xlu1 %1372 }
 0x2b8   : > { %1683 = vmatmul.mubr.msk.bf16.vlgmr.msra.gmra.mxu0 %vm1394_vm10, %v2735_v13 }
 0x374   : > { %v1432_v55 = vpop.f32.mrf.mxu1 }
 0x375   : > { %v1433_v34 = vadd.f32 %v1432_v55, %v1373_v30 }
 0x376   : > { %v1434_v25 = vpop.f32.mrf.mxu1 }
 0x377   : > { %v1435_v48 = vadd.f32 %v1434_v25, %v1373_v30 }
 0x378   : > { %v1473_v45 = vpop.f32.mrf.mxu0  ;;  %v1436_v28 = vpop.f32.mrf.mxu1 }
 0x379   : > { %v1474_v37 = vadd.f32 %v1473_v45, %v1433_v34 }
 0x37a   : > { %v1475_v42 = vpop.f32.mrf.mxu0  ;;  %v1437_v43 = vpop.f32.mrf.mxu1 }
 0x37b   : > { %v1487_v47 = vmul.f32 %v1486_v53, %v1474_v37  ;;  %v1476_v20 = vadd.f32 %v1475_v42, %v1435_v48 }
 0x37c   : > { %v1477_v24 = vpop.f32.mrf.mxu0 }
 0x37d   : > { %v1489_v6 = vsub.f32 %v1792_v57, %v1487_v47  ;;  %v1488_v18 = vmul.f32 %v1486_v53, %v1476_v20 }
 0x37e   : > { %v1478_v23 = vpop.f32.mrf.mxu0 }
 0x37f   : > { %v1492_v63 = vmul.f32 %v1491_v11, %v1489_v6  ;;  %v1490_v56 = vsub.f32 %v1793_v61, %v1488_v18 }
 0x381   : > { %v1500_v44 = vadd.f32 %v1496_v50, %v1492_v63  ;;  %v1493_v52 = vmul.f32 %v1491_v11, %v1490_v56  ;;  %1507 = sbr.rel (%p1685_p5) target bundleno = 905 (0x389), region = 68 }
 0x383   : > { %1502 = vst [vmem:[#allocation2] sm:$0xf] %v1500_v44  ;;  %v1501_v8 = vadd.f32 %v1498_v4, %v1493_v52 }
 0x385   : > { %1503 = vst [vmem:[#allocation2 + $0x8] sm:$0xf] %v1501_v8 }
 0x386   : > { %v1510_v7 = vcombine.low %v1500_v44, %v1501_v8 }
 0x388   : > { %1512 = vst [vmem:[%s432_s26] sm:$0xff] %v1510_v7 }
 0x389 PF: > { %s20_s13 = sadd.s32 1, %s1851_s13   ;;  %s2736_s27 = sld [smem:[#allocation8_spill]] }
 0x38a   : > { %p17_p6 = scmp.ge.s32.totalorder %s20_s13, 10   ;;  %s2737_s18 = sld [smem:[#allocation9_spill]] }
 0x38b   : > { %s2738_s30 = smov %s1843_s11  ;;  %s2739_s10 = smov %s1847_s12 }
 0x38c   :  { %19 = sbr.rel (!%p17_p6) target bundleno = 6 (0x6), region = 115 }
 0x38f   : > { %s2740_s11 = smov %s2736_s27 }
 0x390   : > { %s2741_s12 = smov %s2737_s18 }
 0x391   :  { %1534 = vsyncpa [#allocation6], 1 }
 0x392   :  { %1536 = vsyncpa [#allocation6 + $0x1], 1 }

</bundles_post_ra>
